<compile_context>
chip_gen: v7x
topology: tpu7x:2x2x1
jax: 0.10.0
libtpu: 0.0.40
codegen_flags: <defaults>
</compile_context>

<pallas_src>
import functools
import math

import jax
import jax.numpy as jnp
from jax.experimental import pallas as pl
from jax.experimental.pallas import tpu as pltpu


def _set_conv3x3_kernel(x_ref, w_ref, row_ref, col_ref, o_ref, *, h, w, padl):
    """3x3 / pad-1 conv over one frame-aligned tile of the set-flattened batch.

    x_ref:   [c_in, T]        f32 tile of the [c_in, n*s*h*w] slab (T = frames_per_tile*h*w)
    w_ref:   [c_out, 9*c_in]  f32 tap-major weights, column = (kh*3 + kw)*c_in + ci
    row_ref: [1, T]           int32 in-frame row index of each lane
    col_ref: [1, T]           int32 in-frame col index of each lane
    o_ref:   [c_out, T]
    """
    c_in, t = x_ref.shape
    c_out = o_ref.shape[0]

    # bf16 feed for the MXU; accumulation stays f32.
    x = x_ref[...].astype(jnp.bfloat16)           # [c_in, T]
    wts = w_ref[...]                              # [c_out, 9*c_in] f32
    row = row_ref[...]                            # [1, T] int32
    col = col_ref[...]                            # [1, T] int32

    # Locally zero-padded slab so every tap slice is in-bounds. Tiles are
    # frame-aligned, so anything the pad (or the circular neighbourhood)
    # would corrupt is out-of-frame and killed by the row/col masks anyway.
    zpad = jnp.zeros((c_in, padl), jnp.bfloat16)
    xp = jnp.concatenate([zpad, x, zpad], axis=1)  # [c_in, T + 2*padl]

    acc = jnp.zeros((c_out, t), jnp.float32)       # register-resident
    k = 0
    for dh in (-1, 0, 1):
        for dw in (-1, 0, 1):
            off = dh * w + dw                      # static Python int
            tap = xp[:, padl + off: padl + off + t]          # [c_in, T]

            # In-frame validity of (row+dh, col+dw): cheap VPU compares,
            # replaces the old HBM-resident mask tensor.
            valid = None
            if dh == -1:
                valid = row >= 1
            elif dh == 1:
                valid = row <= h - 2
            if dw == -1:
                c_ok = col >= 1
                valid = c_ok if valid is None else jnp.logical_and(valid, c_ok)
            elif dw == 1:
                c_ok = col <= w - 2
                valid = c_ok if valid is None else jnp.logical_and(valid, c_ok)
            if valid is not None:
                tap = tap * valid.astype(tap.dtype)   # [1,T] bcast over c_in

            wk = wts[:, k * c_in:(k + 1) * c_in].astype(jnp.bfloat16)
            acc = acc + jnp.dot(wk, tap, preferred_element_type=jnp.float32)
            k += 1

    o_ref[...] = acc.astype(o_ref.dtype)


def set_block_conv3x3(x, weight):
    """SetBlockWrapper(BasicConv2d 3x3 / stride 1 / pad 1, no bias).

    x: [n, c_in, s, h, w], weight: [c_out, c_in, 3, 3] -> [n, c_out, s, h, w]
    """
    n, c_in, s, h, w = x.shape
    c_out = weight.shape[0]
    frames = n * s
    fhw = h * w
    bhw = frames * fhw

    # Tile selection: whole frames per tile (no halo needed), lane-dense
    # (multiple of 128), and small enough that the [c_out, T] f32 accumulator
    # stays roughly within half the vreg file.
    acc_budget = 128 * 1024                       # ~32 f32 vregs
    max_t = max(fhw, acc_budget // (4 * c_out))
    fpt = 0
    for cand in range(1, frames + 1):
        t_cand = cand * fhw
        if frames % cand == 0 and t_cand <= max_t and t_cand % 128 == 0:
            fpt = cand
    if fpt == 0:
        fpt = frames                               # whole-slab block (always legal)
    t = fpt * fhw
    grid = (frames // fpt,)

    # SetBlockWrapper fold: s into batch; spatial flattened onto lanes.
    # [n, c, s, h, w] -> [c, n*s*h*w]
    x_flat = jnp.transpose(x, (1, 0, 2, 3, 4)).reshape(c_in, bhw)

    # Tap-major fused weights: column = (kh*3 + kw) * c_in + ci.
    w_fused = jnp.transpose(weight, (0, 2, 3, 1)).reshape(c_out, 9 * c_in)

    # In-frame row/col index per lane of one tile. Tiles are frame-aligned,
    # so the same [1, T] pattern serves every grid step (resident block).
    pos = jnp.arange(t, dtype=jnp.int32) % fhw
    row_idx = (pos // w).reshape(1, t)
    col_idx = (pos % w).reshape(1, t)

    padl = ((w + 1 + 127) // 128) * 128            # lane-aligned local halo pad

    out_flat = pl.pallas_call(
        functools.partial(_set_conv3x3_kernel, h=h, w=w, padl=padl),
        out_shape=jax.ShapeDtypeStruct((c_out, bhw), x.dtype),
        grid=grid,
        in_specs=[
            pl.BlockSpec((c_in, t), lambda i: (0, i)),          # x tile
            pl.BlockSpec((c_out, 9 * c_in), lambda i: (0, 0)),  # weights (resident)
            pl.BlockSpec((1, t), lambda i: (0, 0)),             # row idx (resident)
            pl.BlockSpec((1, t), lambda i: (0, 0)),             # col idx (resident)
        ],
        out_specs=pl.BlockSpec((c_out, t), lambda i: (0, i)),
        compiler_params=pltpu.CompilerParams(
            dimension_semantics=("parallel",)),
    )(x_flat, w_fused, row_idx, col_idx)

    # Unfold back to the PyTorch output layout: [n, c_out, s, h, w].
    return jnp.transpose(out_flat.reshape(c_out, n, s, h, w), (1, 0, 2, 3, 4))


def _reference(x, weight):
    """Exact-f32 elementwise reference (no MXU), mirroring SetBlockWrapper."""
    n, c_in, s, h, w = x.shape
    c_out = weight.shape[0]
    frames = jnp.transpose(x, (0, 2, 1, 3, 4)).reshape(n * s, c_in, h, w)
    fpad = jnp.pad(frames, ((0, 0), (0, 0), (1, 1), (1, 1)))
    out = jnp.zeros((n * s, c_out, h, w), jnp.float32)
    for kh in range(3):
        for kw in range(3):
            patch = fpad[:, :, kh:kh + h, kw:kw + w]          # [B, c_in, h, w]
            wk = weight[:, :, kh, kw]                          # [c_out, c_in]
            out = out + jnp.sum(
                wk[None, :, :, None, None] * patch[:, None, :, :, :], axis=2)
    out = out.reshape(n, s, c_out, h, w)
    return jnp.transpose(out, (0, 2, 1, 3, 4)).astype(x.dtype)


if __name__ == "__main__":
    n, c_in, s, h, w = 2, 4, 8, 16, 16
    c_out = 32

    key = jax.random.PRNGKey(0)
    k_x, k_w = jax.random.split(key)
    x = jax.random.normal(k_x, (n, c_in, s, h, w), dtype=jnp.float32)
    # PyTorch Conv2d default init: kaiming-uniform, bound = 1/sqrt(c_in*k*k).
    bound = 1.0 / math.sqrt(c_in * 3 * 3)
    weight = jax.random.uniform(k_w, (c_out, c_in, 3, 3), jnp.float32,
                                minval=-bound, maxval=bound)

    fwd = jax.jit(set_block_conv3x3)
    out = jax.block_until_ready(fwd(x, weight))

    ref = _reference(x, weight)
    assert out.shape == (n, c_out, s, h, w), out.shape
    # Tolerance accommodates the explicit bf16 MXU feed (36-term f32-accumulated
    # dot) vs the exact-f32 elementwise reference; real layout/shift/mask bugs
    # would produce errors orders of magnitude larger.
    assert jnp.allclose(out, ref, atol=3e-2, rtol=3e-2), float(
        jnp.max(jnp.abs(out - ref)))
    print("KERNEL_OK")
</pallas_src>

<mosaic_0001>
module attributes {stable_mosaic.version = 11 : i64} {
  func.func @_set_conv3x3_kernel(%arg0: i32, %arg1: memref<4x1024xf32, #tpu.memory_space<vmem>>, %arg2: memref<32x36xf32, #tpu.memory_space<vmem>>, %arg3: memref<1x1024xi32, #tpu.memory_space<vmem>>, %arg4: memref<1x1024xi32, #tpu.memory_space<vmem>>, %arg5: memref<32x1024xf32, #tpu.memory_space<vmem>>) attributes {dimension_semantics = [#tpu.dimension_semantics<parallel>], iteration_bounds = array<i64: 4>, scalar_prefetch = 0 : i64, scratch_operands = 0 : i64, tpu.core_type = #tpu.core_type<tc>, window_params = [{transform_indices = @transform_0, window_bounds = array<i64: 4, 1024>}, {pipeline_mode = #tpu.pipeline_mode<synchronous>, transform_indices = @transform_1, window_bounds = array<i64: 32, 36>}, {pipeline_mode = #tpu.pipeline_mode<synchronous>, transform_indices = @transform_2, window_bounds = array<i64: 1, 1024>}, {pipeline_mode = #tpu.pipeline_mode<synchronous>, transform_indices = @transform_3, window_bounds = array<i64: 1, 1024>}, {transform_indices = @transform_4, window_bounds = array<i64: 32, 1024>}]} {
    %c0 = arith.constant 0 : index
    %c0_0 = arith.constant 0 : index
    %0 = vector.load %arg1[%c0, %c0_0] : memref<4x1024xf32, #tpu.memory_space<vmem>>, vector<4x1024xf32>
    %1 = arith.truncf %0 : vector<4x1024xf32> to vector<4x1024xbf16>
    %c0_1 = arith.constant 0 : index
    %c0_2 = arith.constant 0 : index
    %2 = vector.load %arg2[%c0_1, %c0_2] : memref<32x36xf32, #tpu.memory_space<vmem>>, vector<32x36xf32>
    %c0_3 = arith.constant 0 : index
    %c0_4 = arith.constant 0 : index
    %3 = vector.load %arg3[%c0_3, %c0_4] : memref<1x1024xi32, #tpu.memory_space<vmem>>, vector<1x1024xi32>
    %c0_5 = arith.constant 0 : index
    %c0_6 = arith.constant 0 : index
    %4 = vector.load %arg4[%c0_5, %c0_6] : memref<1x1024xi32, #tpu.memory_space<vmem>>, vector<1x1024xi32>
    %cst = arith.constant 0.000000e+00 : bf16
    %5 = vector.broadcast %cst : bf16 to vector<4x128xbf16>
    %6 = tpu.concatenate %5, %1, %5 in 1 : vector<4x128xbf16>, vector<4x1024xbf16>, vector<4x128xbf16> -> vector<4x1280xbf16>
    %cst_7 = arith.constant 0.000000e+00 : f32
    %7 = vector.broadcast %cst_7 : f32 to vector<32x1024xf32>
    %8 = vector.extract_strided_slice %6 {offsets = [0, 111], sizes = [4, 1024], strides = [1, 1]} : vector<4x1280xbf16> to vector<4x1024xbf16>
    %c1_i32 = arith.constant 1 : i32
    %9 = vector.broadcast %c1_i32 : i32 to vector<1x1024xi32>
    %10 = arith.cmpi sge, %3, %9 : vector<1x1024xi32>
    %c1_i32_8 = arith.constant 1 : i32
    %11 = vector.broadcast %c1_i32_8 : i32 to vector<1x1024xi32>
    %12 = arith.cmpi sge, %4, %11 : vector<1x1024xi32>
    %13 = arith.andi %10, %12 : vector<1x1024xi1>
    %14 = arith.extui %13 : vector<1x1024xi1> to vector<1x1024xi32>
    %15 = arith.sitofp %14 : vector<1x1024xi32> to vector<1x1024xf32>
    %16 = arith.truncf %15 : vector<1x1024xf32> to vector<1x1024xbf16>
    %17 = vector.broadcast %16 : vector<1x1024xbf16> to vector<4x1024xbf16>
    %18 = arith.mulf %8, %17 : vector<4x1024xbf16>
    %19 = vector.extract_strided_slice %2 {offsets = [0, 0], sizes = [32, 4], strides = [1, 1]} : vector<32x36xf32> to vector<32x4xf32>
    %20 = arith.truncf %19 : vector<32x4xf32> to vector<32x4xbf16>
    %cst_9 = arith.constant dense<0.000000e+00> : vector<32x1024xf32>
    %21 = tpu.matmul %20, %18, %cst_9 {dimension_numbers = #tpu.dot_dimension_numbers<[1], [0], [0], [1], [0, 0, 1, 1], [], []>} : vector<32x4xbf16>, vector<4x1024xbf16>, vector<32x1024xf32> -> vector<32x1024xf32>
    %22 = arith.addf %7, %21 : vector<32x1024xf32>
    %23 = vector.extract_strided_slice %6 {offsets = [0, 112], sizes = [4, 1024], strides = [1, 1]} : vector<4x1280xbf16> to vector<4x1024xbf16>
    %c1_i32_10 = arith.constant 1 : i32
    %24 = vector.broadcast %c1_i32_10 : i32 to vector<1x1024xi32>
    %25 = arith.cmpi sge, %3, %24 : vector<1x1024xi32>
    %26 = arith.extui %25 : vector<1x1024xi1> to vector<1x1024xi32>
    %27 = arith.sitofp %26 : vector<1x1024xi32> to vector<1x1024xf32>
    %28 = arith.truncf %27 : vector<1x1024xf32> to vector<1x1024xbf16>
    %29 = vector.broadcast %28 : vector<1x1024xbf16> to vector<4x1024xbf16>
    %30 = arith.mulf %23, %29 : vector<4x1024xbf16>
    %31 = vector.extract_strided_slice %2 {offsets = [0, 4], sizes = [32, 4], strides = [1, 1]} : vector<32x36xf32> to vector<32x4xf32>
    %32 = arith.truncf %31 : vector<32x4xf32> to vector<32x4xbf16>
    %cst_11 = arith.constant dense<0.000000e+00> : vector<32x1024xf32>
    %33 = tpu.matmul %32, %30, %cst_11 {dimension_numbers = #tpu.dot_dimension_numbers<[1], [0], [0], [1], [0, 0, 1, 1], [], []>} : vector<32x4xbf16>, vector<4x1024xbf16>, vector<32x1024xf32> -> vector<32x1024xf32>
    %34 = arith.addf %22, %33 : vector<32x1024xf32>
    %35 = vector.extract_strided_slice %6 {offsets = [0, 113], sizes = [4, 1024], strides = [1, 1]} : vector<4x1280xbf16> to vector<4x1024xbf16>
    %c1_i32_12 = arith.constant 1 : i32
    %36 = vector.broadcast %c1_i32_12 : i32 to vector<1x1024xi32>
    %37 = arith.cmpi sge, %3, %36 : vector<1x1024xi32>
    %c14_i32 = arith.constant 14 : i32
    %38 = vector.broadcast %c14_i32 : i32 to vector<1x1024xi32>
    %39 = arith.cmpi sle, %4, %38 : vector<1x1024xi32>
    %40 = arith.andi %37, %39 : vector<1x1024xi1>
    %41 = arith.extui %40 : vector<1x1024xi1> to vector<1x1024xi32>
    %42 = arith.sitofp %41 : vector<1x1024xi32> to vector<1x1024xf32>
    %43 = arith.truncf %42 : vector<1x1024xf32> to vector<1x1024xbf16>
    %44 = vector.broadcast %43 : vector<1x1024xbf16> to vector<4x1024xbf16>
    %45 = arith.mulf %35, %44 : vector<4x1024xbf16>
    %46 = vector.extract_strided_slice %2 {offsets = [0, 8], sizes = [32, 4], strides = [1, 1]} : vector<32x36xf32> to vector<32x4xf32>
    %47 = arith.truncf %46 : vector<32x4xf32> to vector<32x4xbf16>
    %cst_13 = arith.constant dense<0.000000e+00> : vector<32x1024xf32>
    %48 = tpu.matmul %47, %45, %cst_13 {dimension_numbers = #tpu.dot_dimension_numbers<[1], [0], [0], [1], [0, 0, 1, 1], [], []>} : vector<32x4xbf16>, vector<4x1024xbf16>, vector<32x1024xf32> -> vector<32x1024xf32>
    %49 = arith.addf %34, %48 : vector<32x1024xf32>
    %50 = vector.extract_strided_slice %6 {offsets = [0, 127], sizes = [4, 1024], strides = [1, 1]} : vector<4x1280xbf16> to vector<4x1024xbf16>
    %c1_i32_14 = arith.constant 1 : i32
    %51 = vector.broadcast %c1_i32_14 : i32 to vector<1x1024xi32>
    %52 = arith.cmpi sge, %4, %51 : vector<1x1024xi32>
    %53 = arith.extui %52 : vector<1x1024xi1> to vector<1x1024xi32>
    %54 = arith.sitofp %53 : vector<1x1024xi32> to vector<1x1024xf32>
    %55 = arith.truncf %54 : vector<1x1024xf32> to vector<1x1024xbf16>
    %56 = vector.broadcast %55 : vector<1x1024xbf16> to vector<4x1024xbf16>
    %57 = arith.mulf %50, %56 : vector<4x1024xbf16>
    %58 = vector.extract_strided_slice %2 {offsets = [0, 12], sizes = [32, 4], strides = [1, 1]} : vector<32x36xf32> to vector<32x4xf32>
    %59 = arith.truncf %58 : vector<32x4xf32> to vector<32x4xbf16>
    %cst_15 = arith.constant dense<0.000000e+00> : vector<32x1024xf32>
    %60 = tpu.matmul %59, %57, %cst_15 {dimension_numbers = #tpu.dot_dimension_numbers<[1], [0], [0], [1], [0, 0, 1, 1], [], []>} : vector<32x4xbf16>, vector<4x1024xbf16>, vector<32x1024xf32> -> vector<32x1024xf32>
    %61 = arith.addf %49, %60 : vector<32x1024xf32>
    %62 = vector.extract_strided_slice %6 {offsets = [0, 128], sizes = [4, 1024], strides = [1, 1]} : vector<4x1280xbf16> to vector<4x1024xbf16>
    %63 = vector.extract_strided_slice %2 {offsets = [0, 16], sizes = [32, 4], strides = [1, 1]} : vector<32x36xf32> to vector<32x4xf32>
    %64 = arith.truncf %63 : vector<32x4xf32> to vector<32x4xbf16>
    %cst_16 = arith.constant dense<0.000000e+00> : vector<32x1024xf32>
    %65 = tpu.matmul %64, %62, %cst_16 {dimension_numbers = #tpu.dot_dimension_numbers<[1], [0], [0], [1], [0, 0, 1, 1], [], []>} : vector<32x4xbf16>, vector<4x1024xbf16>, vector<32x1024xf32> -> vector<32x1024xf32>
    %66 = arith.addf %61, %65 : vector<32x1024xf32>
    %67 = vector.extract_strided_slice %6 {offsets = [0, 129], sizes = [4, 1024], strides = [1, 1]} : vector<4x1280xbf16> to vector<4x1024xbf16>
    %c14_i32_17 = arith.constant 14 : i32
    %68 = vector.broadcast %c14_i32_17 : i32 to vector<1x1024xi32>
    %69 = arith.cmpi sle, %4, %68 : vector<1x1024xi32>
    %70 = arith.extui %69 : vector<1x1024xi1> to vector<1x1024xi32>
    %71 = arith.sitofp %70 : vector<1x1024xi32> to vector<1x1024xf32>
    %72 = arith.truncf %71 : vector<1x1024xf32> to vector<1x1024xbf16>
    %73 = vector.broadcast %72 : vector<1x1024xbf16> to vector<4x1024xbf16>
    %74 = arith.mulf %67, %73 : vector<4x1024xbf16>
    %75 = vector.extract_strided_slice %2 {offsets = [0, 20], sizes = [32, 4], strides = [1, 1]} : vector<32x36xf32> to vector<32x4xf32>
    %76 = arith.truncf %75 : vector<32x4xf32> to vector<32x4xbf16>
    %cst_18 = arith.constant dense<0.000000e+00> : vector<32x1024xf32>
    %77 = tpu.matmul %76, %74, %cst_18 {dimension_numbers = #tpu.dot_dimension_numbers<[1], [0], [0], [1], [0, 0, 1, 1], [], []>} : vector<32x4xbf16>, vector<4x1024xbf16>, vector<32x1024xf32> -> vector<32x1024xf32>
    %78 = arith.addf %66, %77 : vector<32x1024xf32>
    %79 = vector.extract_strided_slice %6 {offsets = [0, 143], sizes = [4, 1024], strides = [1, 1]} : vector<4x1280xbf16> to vector<4x1024xbf16>
    %c14_i32_19 = arith.constant 14 : i32
    %80 = vector.broadcast %c14_i32_19 : i32 to vector<1x1024xi32>
    %81 = arith.cmpi sle, %3, %80 : vector<1x1024xi32>
    %c1_i32_20 = arith.constant 1 : i32
    %82 = vector.broadcast %c1_i32_20 : i32 to vector<1x1024xi32>
    %83 = arith.cmpi sge, %4, %82 : vector<1x1024xi32>
    %84 = arith.andi %81, %83 : vector<1x1024xi1>
    %85 = arith.extui %84 : vector<1x1024xi1> to vector<1x1024xi32>
    %86 = arith.sitofp %85 : vector<1x1024xi32> to vector<1x1024xf32>
    %87 = arith.truncf %86 : vector<1x1024xf32> to vector<1x1024xbf16>
    %88 = vector.broadcast %87 : vector<1x1024xbf16> to vector<4x1024xbf16>
    %89 = arith.mulf %79, %88 : vector<4x1024xbf16>
    %90 = vector.extract_strided_slice %2 {offsets = [0, 24], sizes = [32, 4], strides = [1, 1]} : vector<32x36xf32> to vector<32x4xf32>
    %91 = arith.truncf %90 : vector<32x4xf32> to vector<32x4xbf16>
    %cst_21 = arith.constant dense<0.000000e+00> : vector<32x1024xf32>
    %92 = tpu.matmul %91, %89, %cst_21 {dimension_numbers = #tpu.dot_dimension_numbers<[1], [0], [0], [1], [0, 0, 1, 1], [], []>} : vector<32x4xbf16>, vector<4x1024xbf16>, vector<32x1024xf32> -> vector<32x1024xf32>
    %93 = arith.addf %78, %92 : vector<32x1024xf32>
    %94 = vector.extract_strided_slice %6 {offsets = [0, 144], sizes = [4, 1024], strides = [1, 1]} : vector<4x1280xbf16> to vector<4x1024xbf16>
    %c14_i32_22 = arith.constant 14 : i32
    %95 = vector.broadcast %c14_i32_22 : i32 to vector<1x1024xi32>
    %96 = arith.cmpi sle, %3, %95 : vector<1x1024xi32>
    %97 = arith.extui %96 : vector<1x1024xi1> to vector<1x1024xi32>
    %98 = arith.sitofp %97 : vector<1x1024xi32> to vector<1x1024xf32>
    %99 = arith.truncf %98 : vector<1x1024xf32> to vector<1x1024xbf16>
    %100 = vector.broadcast %99 : vector<1x1024xbf16> to vector<4x1024xbf16>
    %101 = arith.mulf %94, %100 : vector<4x1024xbf16>
    %102 = vector.extract_strided_slice %2 {offsets = [0, 28], sizes = [32, 4], strides = [1, 1]} : vector<32x36xf32> to vector<32x4xf32>
    %103 = arith.truncf %102 : vector<32x4xf32> to vector<32x4xbf16>
    %cst_23 = arith.constant dense<0.000000e+00> : vector<32x1024xf32>
    %104 = tpu.matmul %103, %101, %cst_23 {dimension_numbers = #tpu.dot_dimension_numbers<[1], [0], [0], [1], [0, 0, 1, 1], [], []>} : vector<32x4xbf16>, vector<4x1024xbf16>, vector<32x1024xf32> -> vector<32x1024xf32>
    %105 = arith.addf %93, %104 : vector<32x1024xf32>
    %106 = vector.extract_strided_slice %6 {offsets = [0, 145], sizes = [4, 1024], strides = [1, 1]} : vector<4x1280xbf16> to vector<4x1024xbf16>
    %c14_i32_24 = arith.constant 14 : i32
    %107 = vector.broadcast %c14_i32_24 : i32 to vector<1x1024xi32>
    %108 = arith.cmpi sle, %3, %107 : vector<1x1024xi32>
    %c14_i32_25 = arith.constant 14 : i32
    %109 = vector.broadcast %c14_i32_25 : i32 to vector<1x1024xi32>
    %110 = arith.cmpi sle, %4, %109 : vector<1x1024xi32>
    %111 = arith.andi %108, %110 : vector<1x1024xi1>
    %112 = arith.extui %111 : vector<1x1024xi1> to vector<1x1024xi32>
    %113 = arith.sitofp %112 : vector<1x1024xi32> to vector<1x1024xf32>
    %114 = arith.truncf %113 : vector<1x1024xf32> to vector<1x1024xbf16>
    %115 = vector.broadcast %114 : vector<1x1024xbf16> to vector<4x1024xbf16>
    %116 = arith.mulf %106, %115 : vector<4x1024xbf16>
    %117 = vector.extract_strided_slice %2 {offsets = [0, 32], sizes = [32, 4], strides = [1, 1]} : vector<32x36xf32> to vector<32x4xf32>
    %118 = arith.truncf %117 : vector<32x4xf32> to vector<32x4xbf16>
    %cst_26 = arith.constant dense<0.000000e+00> : vector<32x1024xf32>
    %119 = tpu.matmul %118, %116, %cst_26 {dimension_numbers = #tpu.dot_dimension_numbers<[1], [0], [0], [1], [0, 0, 1, 1], [], []>} : vector<32x4xbf16>, vector<4x1024xbf16>, vector<32x1024xf32> -> vector<32x1024xf32>
    %120 = arith.addf %105, %119 : vector<32x1024xf32>
    %c0_27 = arith.constant 0 : index
    %c0_28 = arith.constant 0 : index
    %121 = vector.load %arg5[%c0_27, %c0_28] : memref<32x1024xf32, #tpu.memory_space<vmem>>, vector<32x1024xf32>
    tpu.vector_store %arg5[%c0_27, %c0_28], %120 {strides = array<i32>} : memref<32x1024xf32, #tpu.memory_space<vmem>>, vector<32x1024xf32>,
    return
  }
  func.func @transform_0(%arg0: i32) -> (i32, i32) {
    %c0_i32 = arith.constant 0 : i32
    %c0_i32_0 = arith.constant 0 : i32
    return %c0_i32, %arg0 : i32, i32
  }
  func.func @transform_1(%arg0: i32) -> (i32, i32) {
    %c0_i32 = arith.constant 0 : i32
    %c0_i32_0 = arith.constant 0 : i32
    %c0_i32_1 = arith.constant 0 : i32
    return %c0_i32, %c0_i32_0 : i32, i32
  }
  func.func @transform_2(%arg0: i32) -> (i32, i32) {
    %c0_i32 = arith.constant 0 : i32
    %c0_i32_0 = arith.constant 0 : i32
    %c0_i32_1 = arith.constant 0 : i32
    return %c0_i32, %c0_i32_0 : i32, i32
  }
  func.func @transform_3(%arg0: i32) -> (i32, i32) {
    %c0_i32 = arith.constant 0 : i32
    %c0_i32_0 = arith.constant 0 : i32
    %c0_i32_1 = arith.constant 0 : i32
    return %c0_i32, %c0_i32_0 : i32, i32
  }
  func.func @transform_4(%arg0: i32) -> (i32, i32) {
    %c0_i32 = arith.constant 0 : i32
    %c0_i32_0 = arith.constant 0 : i32
    return %c0_i32, %arg0 : i32, i32
  }
}

</mosaic_0001>

<bundles_post_ra>
// kernel: set_block_conv3x3.1
= control target key start
LH: loop header
LB: loop body
LE: loop exit
PB: predicated region body
PF: predicated region fallthrough
CT: control target
= control target key end

     0   :  { %s4878_s15 = smov 0   ;;  %s4880_s16 = smov 0   ;;  %s5908_s0 = inlined_call_operand.vmem [shape: f32[4,4096], index: 0, kind: input, shape index: {}]   ;;  %s5909_s1 = inlined_call_operand.vmem [shape: f32[32,36], index: 1, kind: input, shape index: {}]   ;;  %s5910_s2 = inlined_call_operand.vmem [shape: s32[1,1024], index: 2, kind: input, shape index: {}]   ;;  %s5911_s3 = inlined_call_operand.vmem [shape: s32[1,1024], index: 3, kind: input, shape index: {}]   ;;  %s5912_s4 = inlined_call_operand.vmem [shape: f32[32,4096], index: 4, kind: output, shape index: {}]  }
   0x1   :  { %s4882_s17 = smov 0  }
   0x2 LB: > { %s4891_s18 = sadd.s32 4294967295, %s4834_s17   ;;  %s4893_s19 = sadd.s32 1, %s4834_s17   ;;  %s4834_s17 = sphi %s4882_s17, %s5916_s17   ;;  %s4830_s16 = sphi %s4880_s16, %s5915_s16   ;;  %s4826_s15 = sphi %s4878_s15, %s5914_s15  }
   0x3   : > { %s107_s20 = ssub.s32 %s4834_s17, %s4893_s19  ;;  %s110_s21 = sadd.s32 1, %s4830_s16 }
   0x4   : > { %p108_p0 = scmp.eq.s32.totalorder %s107_s20, 0  ;;  %p120_p1 = scmp.ne.s32.totalorder %s4830_s16, %s4826_s15 }
   0x5   : > { %p121_p2 = scmp.eq.s32.totalorder %s4891_s18, 3  ;;  %p4385_p3 = scmp.ge.s32.totalorder %s4834_s17, 1 }
   0x6   : > { %s4901_s22 = scalar_select %p108_p0, %s4830_s16, %s110_s21  }
   0x7   : > { %p4903_p4 = por %p121_p2, %p120_p1  ;;  %p163_p5 = scmp.lt.s32.totalorder %s4834_s17, 5 }
   0x9   : > { %p164_p6 = pnand %p4385_p3, %p163_p5 }
   0xa   : > { %v4910_v0 = vld [vmem:[%s5910_s2] sm:$0xff] (!%p164_p6)  ;;  %v232_v1 = vlaneseq (!%p164_p6)  ;;  %v4836_v4 = vmov (!%p164_p6), 0.0   ;;  %s4837_s28 = smov (!%p164_p6), 112   ;;  %s4838_s29 = smov (!%p164_p6), 111   ;;  %vm519_vm5 = vcmask (!%p164_p6), 916480   ;;  %vm360_vm6 = vcmask (!%p164_p6), 908288  }
   0xb   : > { %167 = sbr.rel (%p164_p6) target bundleno = 972 (0x3cc), region = 36  ;;  %v4915_v2 = vld [vmem:[%s5911_s3] sm:$0xff] (!%p164_p6)  ;;  %vm226_vm0 = vcmp.ge.s32.totalorder (!%p164_p6), %v4910_v0, 1  ;;  %s4839_s30 = smov (!%p164_p6), 113   ;;  %vm1242_vm7 = vcmask (!%p164_p6), 924672   ;;  %vm578_vm8 = vcmask (!%p164_p6), 130048  }
   0xc   : > { %v233_v3 = vshrl.u32 (!%p164_p6), %v232_v1, 7  ;;  %v4390_v5 = vsel (!%p164_p6), %vm226_vm0, 1.0, %v4836_v4  ;;  %vm227_vm1 = vcmp.ge.s32.totalorder (!%p164_p6), %v4915_v2, 1  ;;  %vm1109_vm3 = vcmp.le.s32.totalorder (!%p164_p6), %v4915_v2, 14  ;;  %s4840_s9 = smov (!%p164_p6), 124   ;;  %s4387_s10 = sshll.u32 (!%p164_p6), %s4891_s18, 3 }
   0xd   : > { %vm228_vm2 = vmand (!%p164_p6), %vm226_vm0, %vm227_vm1  ;;  %p189_p7 = scmp.lt.s32.totalorder (!%p164_p6), %s4387_s10, 31  ;;  %s4842_s17 = smov (!%p164_p6), 16   ;;  %vm594_vm9 = vcmask (!%p164_p6), 1041408   ;;  %vm587_vm10 = vcmask (!%p164_p6), 31744   ;;  %vm1713_vm11 = vcmask (!%p164_p6), 1039360   ;;  %vm858_vm12 = vcmask (!%p164_p6), 138240  }
   0xe   : > { %v4922_v6 = vsub.s32 (!%p164_p6), 0, %v233_v3  ;;  %v4924_v7 = vsub.s32 (!%p164_p6), 2, %v233_v3  ;;  %v4926_v8 = vsub.s32 (!%p164_p6), 3, %v233_v3  ;;  %v4928_v9 = vsub.s32 (!%p164_p6), 1, %v233_v3  ;;  %vm1110_vm4 = vmand (!%p164_p6), %vm226_vm0, %vm1109_vm3  ;;  %s4843_s26 = smov (!%p164_p6), 17   ;;  %s4844_s27 = smov (!%p164_p6), 127  }
   0xf   : > { %v4930_v10 = vsub.s32 (!%p164_p6), 4, %v233_v3  ;;  %v4932_v11 = vsub.s32 (!%p164_p6), 5, %v233_v3  ;;  %v4934_v12 = vsub.s32 (!%p164_p6), 6, %v233_v3  ;;  %v4936_v13 = vsub.s32 (!%p164_p6), 7, %v233_v3  ;;  %s4845_s5 = smov (!%p164_p6), 15   ;;  %s4846_s6 = smov (!%p164_p6), 120  }
  0x10   : > { %v402_v14 = vrot.slane (!%p164_p6), %v4390_v5, %v4924_v7  ;;  %v394_v15 = vrot.slane (!%p164_p6), %v4390_v5, %v4922_v6  ;;  %v406_v16 = vrot.slane (!%p164_p6), %v4390_v5, %v4926_v8  ;;  %v398_v17 = vrot.slane (!%p164_p6), %v4390_v5, %v4928_v9  ;;  %s4847_s7 = smov (!%p164_p6), 1   ;;  %s4848_s8 = smov (!%p164_p6), 116  }
  0x11   : > { %v410_v18 = vrot.slane (!%p164_p6), %v4390_v5, %v4930_v10  ;;  %v414_v19 = vrot.slane (!%p164_p6), %v4390_v5, %v4932_v11  ;;  %v418_v20 = vrot.slane (!%p164_p6), %v4390_v5, %v4934_v12  ;;  %v422_v27 = vrot.slane (!%p164_p6), %v4390_v5, %v4936_v13 }
  0x12   : > { %v433_v21 = vpack.c.bf16 %v402_v14, %v402_v14  ;;  %v431_v22 = vpack.c.bf16 %v394_v15, %v394_v15  ;;  %v434_v23 = vpack.c.bf16 %v406_v16, %v406_v16  ;;  %v432_v24 = vpack.c.bf16 %v398_v17, %v398_v17  ;;  %s5918_s10 = smov (!%p189_p7, %s4387_s10), 31 }
  0x13   : > { %v435_v25 = vpack.c.bf16 %v410_v18, %v410_v18  ;;  %v436_v26 = vpack.c.bf16 %v414_v19, %v414_v19  ;;  %v4389_v32 = vsel %vm228_vm2, 1.0, %v4836_v4  ;;  %v437_v35 = vpack.c.bf16 %v418_v20, %v418_v20  ;;  %s4388_s11 = sshll.u32 %s5918_s10, 2  ;;  %s4850_s10 = smov 104  }
  0x14   : > { %v454_v28 = vpack.i.b16 %v433_v21, %v433_v21  ;;  %v440_v29 = vpack.i.b16 %v431_v22, %v431_v22  ;;  %v461_v30 = vpack.i.b16 %v434_v23, %v434_v23  ;;  %v447_v31 = vpack.i.b16 %v432_v24, %v432_v24  ;;  %s5033_s14 = scalar_lea.vmem %s5908_s0, %s4388_s11 }
  0x15   : > { %v468_v37 = vpack.i.b16 %v435_v25, %v435_v25  ;;  %v475_v38 = vpack.i.b16 %v436_v26, %v436_v26  ;;  %v438_v39 = vpack.c.bf16 %v422_v27, %v422_v27  ;;  %v239_v41 = vrot.slane %v4389_v32, %v4928_v9 }
  0x16   : > { %v459_v33 = vrot.slane %v454_v28, %v4922_v6  ;;  %v445_v34 = vrot.slane %v440_v29, %v4922_v6  ;;  %v466_v36 = vrot.slane %v461_v30, %v4922_v6  ;;  %v452_v40 = vrot.slane %v447_v31, %v4922_v6 }
  0x17   : > { %v235_v42 = vrot.slane %v4389_v32, %v4922_v6  ;;  %v482_v43 = vpack.i.b16 %v437_v35, %v437_v35  ;;  %v473_v44 = vrot.slane %v468_v37, %v4922_v6  ;;  %v480_v45 = vrot.slane %v475_v38, %v4922_v6 }
  0x18   : > { %507 = vrot.lane.b32.xlu1 %v459_v33, %s4837_s28  ;;  %503 = vrot.lane.b32.xlu0 %v445_v34, %s4837_s28  ;;  %v489_v46 = vpack.i.b16 %v438_v39, %v438_v39  ;;  %v247_v47 = vrot.slane %v4389_v32, %v4926_v8  ;;  %v273_v48 = vpack.c.bf16 %v239_v41, %v239_v41  ;;  %v4983_v14 = vsel %vm1110_vm4, 1.0, %v4836_v4 }
  0x19   : > { %v272_v49 = vpack.c.bf16 %v235_v42, %v235_v42  ;;  %v243_v50 = vrot.slane %v4389_v32, %v4924_v7  ;;  %v487_v51 = vrot.slane %v482_v43, %v4922_v6  ;;  %v255_v54 = vrot.slane %v4389_v32, %v4932_v11 }
  0x1a   : > { %v494_v52 = vrot.slane %v489_v46, %v4922_v6  ;;  %v275_v53 = vpack.c.bf16 %v247_v47, %v247_v47  ;;  %v251_v55 = vrot.slane %v4389_v32, %v4930_v10  ;;  %v288_v56 = vpack.i.b16 %v273_v48, %v273_v48  ;;  %v220_v46 = vld [vmem:[%s5909_s1] sm:$0xff]  ;;  %v221_v47 = vld [vmem:[%s5909_s1 + $0x8] sm:$0xff] }
  0x1b   : > { %v281_v57 = vpack.i.b16 %v272_v49, %v272_v49  ;;  %v274_v58 = vpack.c.bf16 %v243_v50, %v243_v50  ;;  %v263_v59 = vrot.slane %v4389_v32, %v4936_v13  ;;  %v277_v61 = vpack.c.bf16 %v255_v54, %v255_v54  ;;  %v196_v50 = vld [vmem:[%s5033_s14] sm:$0xff] }
  0x1c   : > { %509 = vrot.lane.b32.xlu1 %v466_v36, %s4837_s28  ;;  %505 = vrot.lane.b32.xlu0 %v452_v40, %s4837_s28  ;;  %v302_v60 = vpack.i.b16 %v275_v53, %v275_v53  ;;  %v276_v62 = vpack.c.bf16 %v251_v55, %v251_v55  ;;  %v259_v63 = vrot.slane %v4389_v32, %v4934_v12  ;;  %vm2800_vm13 = vcmp.le.s32.totalorder %v4910_v0, 14 }
  0x1d   : > { %v293_v1 = vrot.slane %v288_v56, %v4922_v6  ;;  %v286_v3 = vrot.slane %v281_v57, %v4922_v6  ;;  %v295_v5 = vpack.i.b16 %v274_v58, %v274_v58  ;;  %v279_v15 = vpack.c.bf16 %v263_v59, %v263_v59  ;;  %v197_v57 = vld [vmem:[%s5033_s14 + $0x8] sm:$0xff]  ;;  %vm2801_vm14 = vmand %vm2800_vm13, %vm227_vm1 }
  0x1e   : > { %v307_v16 = vrot.slane %v302_v60, %v4922_v6  ;;  %v316_v17 = vpack.i.b16 %v277_v61, %v277_v61  ;;  %v309_v18 = vpack.i.b16 %v276_v62, %v276_v62  ;;  %v278_v19 = vpack.c.bf16 %v259_v63, %v259_v63 }
  0x1f   : > { %v300_v20 = vrot.slane %v295_v5, %v4922_v6  ;;  %v1117_v21 = vrot.slane %v4983_v14, %v4922_v6  ;;  %v1121_v22 = vrot.slane %v4983_v14, %v4928_v9  ;;  %v330_v23 = vpack.i.b16 %v279_v15, %v279_v15 }
  0x20   : > { %511 = vrot.lane.b32.xlu0 %v473_v44, %s4837_s28  ;;  %513 = vrot.lane.b32.xlu1 %v480_v45, %s4837_s28  ;;  %v321_v24 = vrot.slane %v316_v17, %v4922_v6  ;;  %v314_v25 = vrot.slane %v309_v18, %v4922_v6  ;;  %v323_v26 = vpack.i.b16 %v278_v19, %v278_v19  ;;  %vm1299_vm15 = vcmask 121856  }
  0x21   : > { %v1125_v27 = vrot.slane %v4983_v14, %v4924_v7  ;;  %v1154_v28 = vpack.c.bf16 %v1117_v21, %v1117_v21  ;;  %v1155_v29 = vpack.c.bf16 %v1121_v22, %v1121_v22  ;;  %v1129_v30 = vrot.slane %v4983_v14, %v4926_v8 }
  0x22   : > { %v335_v31 = vrot.slane %v330_v23, %v4922_v6  ;;  %v328_v32 = vrot.slane %v323_v26, %v4922_v6  ;;  %v1133_v34 = vrot.slane %v4983_v14, %v4930_v10  ;;  %v5024_v49 = vpack.c.bf16 %v221_v47, %v220_v46 }
  0x23   : > { %v1156_v33 = vpack.c.bf16 %v1125_v27, %v1125_v27  ;;  %v1163_v35 = vpack.i.b16 %v1154_v28, %v1154_v28  ;;  %v1170_v36 = vpack.i.b16 %v1155_v29, %v1155_v29  ;;  %v1157_v37 = vpack.c.bf16 %v1129_v30, %v1129_v30 }
  0x24   : > { %515 = vrot.lane.b32.xlu0 %v487_v51, %s4837_s28  ;;  %517 = vrot.lane.b32.xlu1 %v494_v52, %s4837_s28  ;;  %v1158_v39 = vpack.c.bf16 %v1133_v34, %v1133_v34  ;;  %v204_v51 = vcombine.high %v196_v50, %v196_v50  ;;  %v4841_v52 = vmov 0   ;;  %v1137_v55 = vrot.slane %v4983_v14, %v4932_v11 }
  0x25   : > { %v1177_v38 = vpack.i.b16 %v1156_v33, %v1156_v33  ;;  %v1168_v40 = vrot.slane %v1163_v35, %v4922_v6  ;;  %v1175_v41 = vrot.slane %v1170_v36, %v4922_v6  ;;  %v1184_v42 = vpack.i.b16 %v1157_v37, %v1157_v37  ;;  %651 = vmatprep.mubr.bf16.mxu0 %v4841_v52 }
  0x26   : > { %v1191_v45 = vpack.i.b16 %v1158_v39, %v1158_v39  ;;  %704 = vmatprep.mubr.bf16.mxu1 %v4841_v52  ;;  %v5041_v58 = vpack.c.bf16 %v196_v50, %v196_v50  ;;  %v5043_v59 = vpack.c.bf16 %v204_v51, %v204_v51  ;;  %v205_v60 = vcombine.high %v197_v57, %v197_v57 }
  0x27   : > { %v1182_v43 = vrot.slane %v1177_v38, %v4922_v6  ;;  %v1189_v44 = vrot.slane %v1184_v42, %v4922_v6  ;;  %v1159_v63 = vpack.c.bf16 %v1137_v55, %v1137_v55  ;;  %v5053_v18 = vpack.c.bf16 %v197_v57, %v197_v57  ;;  %v198_v38 = vld [vmem:[%s5033_s14 + $0x10] sm:$0xff] }
  0x28   : > { %346 = vrot.lane.b32.xlu1 %v293_v1, %s4838_s29  ;;  %344 = vrot.lane.b32.xlu0 %v286_v3, %s4838_s29  ;;  %v1196_v48 = vrot.slane %v1191_v45, %v4922_v6  ;;  %v199_v1 = vld [vmem:[%s5033_s14 + $0x18] sm:$0xff]  ;;  %v1145_v3 = vrot.slane %v4983_v14, %v4936_v13  ;;  %v5055_v19 = vpack.c.bf16 %v205_v60, %v205_v60  ;;  %vm1770_vm0 = vcmask 7168  }
  0x29   : > { %v207_v21 = vcombine.high %v199_v1, %v199_v1  ;;  %v1198_v26 = vpack.i.b16 %v1159_v63, %v1159_v63  ;;  %v1141_v28 = vrot.slane %v4983_v14, %v4934_v12  ;;  %v5081_v14 = vsel %vm227_vm1, 1.0, %v4836_v4  ;;  %vm3740_vm1 = vmand %vm2800_vm13, %vm1109_vm3 }
  0x2a   : > { %v1161_v27 = vpack.c.bf16 %v1145_v3, %v1145_v3  ;;  %v1588_v39 = vrot.slane %v5081_v14, %v4922_v6  ;;  %v1592_v46 = vrot.slane %v5081_v14, %v4928_v9  ;;  %v1596_v51 = vrot.slane %v5081_v14, %v4924_v7 }
  0x2b   : > { %v5073_v33 = vpack.c.bf16 %v207_v21, %v207_v21  ;;  %v1203_v34 = vrot.slane %v1198_v26, %v4922_v6  ;;  %v1160_v36 = vpack.c.bf16 %v1141_v28, %v1141_v28  ;;  %v5104_v55 = vpack.c.bf16 %v199_v1, %v199_v1 }
  0x2c   : > { %350 = vrot.lane.b32.xlu1 %v307_v16, %s4838_s29  ;;  %348 = vrot.lane.b32.xlu0 %v300_v20, %s4838_s29  ;;  %v1212_v35 = vpack.i.b16 %v1161_v27, %v1161_v27  ;;  %v1625_v50 = vpack.c.bf16 %v1588_v39, %v1588_v39  ;;  %v1626_v60 = vpack.c.bf16 %v1592_v46, %v1592_v46 }
  0x2d   : > { %v1205_v42 = vpack.i.b16 %v1160_v36, %v1160_v36  ;;  %v1627_v63 = vpack.c.bf16 %v1596_v51, %v1596_v51 }
  0x30   : > { %354 = vrot.lane.b32.xlu1 %v321_v24, %s4838_s29  ;;  %352 = vrot.lane.b32.xlu0 %v314_v25, %s4838_s29  ;;  %v222_v24 = vld [vmem:[%s5909_s1 + $0x10] sm:$0xff]  ;;  %v223_v25 = vld [vmem:[%s5909_s1 + $0x18] sm:$0xff] }
  0x34   : > { %358 = vrot.lane.b32.xlu1 %v335_v31, %s4838_s29  ;;  %356 = vrot.lane.b32.xlu0 %v328_v32, %s4838_s29  ;;  %v5071_v32 = vpack.c.bf16 %v223_v25, %v222_v24  ;;  %v1604_v24 = vrot.slane %v5081_v14, %v4930_v10  ;;  %v1600_v25 = vrot.slane %v5081_v14, %v4926_v8 }
  0x38   : > { %1226 = vrot.lane.b32.xlu1 %v1168_v40, %s4839_s30  ;;  %1228 = vrot.lane.b32.xlu0 %v1175_v41, %s4839_s30  ;;  %v1217_v41 = vrot.slane %v1212_v35, %v4922_v6  ;;  %v1628_v35 = vpack.c.bf16 %v1600_v25, %v1600_v25 }
  0x3c   : > { %1230 = vrot.lane.b32.xlu1 %v1182_v43, %s4839_s30  ;;  %1232 = vrot.lane.b32.xlu0 %v1189_v44, %s4839_s30  ;;  %v5091_v43 = vpack.c.bf16 %v198_v38, %v198_v38  ;;  %v206_v44 = vcombine.high %v198_v38, %v198_v38 }
  0x40   : > { %1234 = vrot.lane.b32.xlu1 %v1196_v48, %s4839_s30  ;;  %547 = vrot.lane.b32.xlu0 %v5024_v49, %s4840_s9  ;;  %v1210_v48 = vrot.slane %v1205_v42, %v4922_v6  ;;  %v1655_v42 = vpack.i.b16 %v1628_v35, %v1628_v35 }
  0x8a   : > { %v508_v53 = vpop.permute.xlu1 %507  ;;  %v504_v54 = vpop.permute.xlu0 %503 }
  0x8b   : > { %v536_v56 = vmul.bf16 0, %v504_v54 }
  0x8d   : > { %560 = vrot.lane.b32.xlu0 %v536_v56, %s4842_s17 }
  0x8e   : > { %v510_v61 = vpop.permute.xlu1 %509  ;;  %v506_v62 = vpop.permute.xlu0 %505 }
  0x8f   : > { %v520_v5 = vsel %vm519_vm5, %v504_v54, %v506_v62  ;;  %v521_v15 = vsel %vm519_vm5, %v506_v62, %v508_v53  ;;  %v522_v20 = vsel %vm519_vm5, %v508_v53, %v510_v61  ;;  %v5102_v54 = vpack.c.bf16 %v206_v44, %v206_v44 }
  0x90   : > { %v537_v16 = vmul.bf16 %v520_v5, %v5041_v58  ;;  %v538_v17 = vmul.bf16 %v521_v15, %v5043_v59  ;;  %v539_v30 = vmul.bf16 %v522_v20, %v5053_v18  ;;  %v1634_v62 = vpack.i.b16 %v1625_v50, %v1625_v50 }
  0x91   : > { %v1641_v15 = vpack.i.b16 %v1626_v60, %v1626_v60  ;;  %v1648_v20 = vpack.i.b16 %v1627_v63, %v1627_v63  ;;  %v1612_v50 = vrot.slane %v5081_v14, %v4934_v12 }
  0x92   : > { %v512_v22 = vpop.permute.xlu0 %511  ;;  %562 = vrot.lane.b32.xlu1 %v537_v16, %s4842_s17  ;;  %564 = vrot.lane.b32.xlu0 %v538_v17, %s4842_s17  ;;  %v514_v23 = vpop.permute.xlu1 %513  ;;  %v1639_v16 = vrot.slane %v1634_v62, %v4922_v6 }
  0x93   : > { %v523_v29 = vsel %vm519_vm5, %v510_v61, %v512_v22  ;;  %v524_v45 = vsel %vm519_vm5, %v512_v22, %v514_v23  ;;  %v1646_v22 = vrot.slane %v1641_v15, %v4922_v6  ;;  %v1631_v60 = vpack.c.bf16 %v1612_v50, %v1612_v50 }
  0x94   : > { %v540_v31 = vmul.bf16 %v523_v29, %v5055_v19  ;;  %v541_v53 = vmul.bf16 %v524_v45, %v5091_v43 }
  0x95   : > { %v1676_v15 = vpack.i.b16 %v1631_v60, %v1631_v60 }
  0x96   : > { %566 = vrot.lane.b32.xlu1 %v539_v30, %s4842_s17  ;;  %568 = vrot.lane.b32.xlu0 %v540_v31, %s4842_s17  ;;  %v518_v37 = vpop.permute.xlu1 %517  ;;  %v516_v47 = vpop.permute.xlu0 %515  ;;  %v1608_v30 = vrot.slane %v5081_v14, %v4932_v11 }
  0x97   : > { %v544_v40 = vmul.bf16 %v518_v37, %v5073_v33  ;;  %v525_v56 = vsel %vm519_vm5, %v514_v23, %v516_v47  ;;  %v526_v57 = vsel %vm519_vm5, %v516_v47, %v518_v37  ;;  %v1653_v23 = vrot.slane %v1648_v20, %v4922_v6 }
  0x98   : > { %v542_v3 = vmul.bf16 %v525_v56, %v5102_v54  ;;  %v543_v5 = vmul.bf16 %v526_v57, %v5104_v55  ;;  %v1630_v39 = vpack.c.bf16 %v1608_v30, %v1608_v30 }
  0x9a   : > { %549 = vrot.lane.b32.xlu1 %v5071_v32, %s4840_s9  ;;  %1236 = vrot.lane.b32.xlu0 %v1203_v34, %s4839_s30  ;;  %v345_v61 = vpop.permute.xlu0 %344  ;;  %v347_v21 = vpop.permute.xlu1 %346  ;;  %v1629_v34 = vpack.c.bf16 %v1604_v24, %v1604_v24  ;;  %v1669_v46 = vpack.i.b16 %v1630_v39, %v1630_v39  ;;  %s4849_s9 = smov 108  }
  0x9b   : > { %v377_v1 = vmul.bf16 0, %v345_v61  ;;  %v361_v28 = vsel %vm360_vm6, %v345_v61, %v347_v21  ;;  %v1616_v61 = vrot.slane %v5081_v14, %v4936_v13  ;;  %v1681_v14 = vrot.slane %v1676_v15, %v4922_v6 }
  0x9c   : > { %v378_v37 = vmul.bf16 %v361_v28, %v5041_v58  ;;  %v1674_v56 = vrot.slane %v1669_v46, %v4922_v6 }
  0x9e   : > { %576 = vrot.lane.b32.xlu1 %v544_v40, %s4842_s17  ;;  %1240 = vrot.lane.b32.xlu0 %v1217_v41, %s4839_s30  ;;  %v349_v17 = vpop.permute.xlu0 %348  ;;  %v351_v29 = vpop.permute.xlu1 %350  ;;  %v1662_v41 = vpack.i.b16 %v1629_v34, %v1629_v34 }
  0x9f   : > { %v362_v26 = vsel %vm360_vm6, %v347_v21, %v349_v17  ;;  %v363_v38 = vsel %vm360_vm6, %v349_v17, %v351_v29 }
  0xa0   : > { %v379_v31 = vmul.bf16 %v362_v26, %v5043_v59  ;;  %v380_v45 = vmul.bf16 %v363_v38, %v5053_v18  ;;  %v1667_v47 = vrot.slane %v1662_v41, %v4922_v6 }
  0xa2   : > { %1238 = vrot.lane.b32.xlu1 %v1210_v48, %s4839_s30  ;;  %570 = vrot.lane.b32.xlu0 %v541_v53, %s4842_s17  ;;  %v353_v27 = vpop.permute.xlu0 %352  ;;  %v355_v44 = vpop.permute.xlu1 %354  ;;  %v1660_v48 = vrot.slane %v1655_v42, %v4922_v6 }
  0xa3   : > { %v364_v36 = vsel %vm360_vm6, %v351_v29, %v353_v27 }
  0xa4   : > { %v381_v40 = vmul.bf16 %v364_v36, %v5055_v19 }
  0xa6   : > { %572 = vrot.lane.b32.xlu1 %v542_v3, %s4842_s17  ;;  %574 = vrot.lane.b32.xlu0 %v543_v5, %s4842_s17  ;;  %v359_v51 = vpop.permute.xlu1 %358  ;;  %v357_v53 = vpop.permute.xlu0 %356  ;;  %v365_v3 = vsel %vm360_vm6, %v353_v27, %v355_v44 }
  0xa7   : > { %v385_v57 = vmul.bf16 %v359_v51, %v5073_v33  ;;  %v366_v62 = vsel %vm360_vm6, %v355_v44, %v357_v53  ;;  %v382_v17 = vmul.bf16 %v365_v3, %v5091_v43 }
  0xa8   : > { %v383_v5 = vmul.bf16 %v366_v62, %v5102_v54 }
  0xaa   : > { %840 = vrot.lane.b32.xlu1 %v377_v1, %s4843_s26  ;;  %1697 = vrot.lane.b32.xlu0 %v1639_v16, %s4844_s27  ;;  %v1227_v63 = vpop.permute.xlu1 %1226  ;;  %v1632_v1 = vpack.c.bf16 %v1616_v61, %v1616_v61  ;;  %v367_v16 = vsel %vm360_vm6, %v357_v53, %v359_v51 }
  0xab   : > { %v384_v20 = vmul.bf16 %v367_v16, %v5104_v55  ;;  %v1259_v25 = vmul.bf16 0, %v1227_v63 }
  0xac   : > { %v1683_v21 = vpack.i.b16 %v1632_v1, %v1632_v1 }
  0xae   : > { %1699 = vrot.lane.b32.xlu1 %v1646_v22, %s4844_s27  ;;  %1701 = vrot.lane.b32.xlu0 %v1653_v23, %s4844_s27  ;;  %v1229_v22 = vpop.permute.xlu0 %1228  ;;  %v1231_v23 = vpop.permute.xlu1 %1230  ;;  %v1688_v24 = vrot.slane %v1683_v21, %v4922_v6 }
  0xaf   : > { %v1243_v26 = vsel %vm1242_vm7, %v1227_v63, %v1229_v22  ;;  %v1244_v27 = vsel %vm1242_vm7, %v1229_v22, %v1231_v23 }
  0xb0   : > { %v1261_v30 = vmul.bf16 %v1244_v27, %v5043_v59 }
  0xb2   : > { %842 = vrot.lane.b32.xlu0 %v378_v37, %s4843_s26  ;;  %844 = vrot.lane.b32.xlu1 %v379_v31, %s4843_s26  ;;  %v1233_v28 = vpop.permute.xlu0 %1232  ;;  %v5165_v29 = vpop.permute.xlu1 %1234  ;;  %v1260_v31 = vmul.bf16 %v1243_v26, %v5041_v58 }
  0xb3   : > { %v1245_v34 = vsel %vm1242_vm7, %v1231_v23, %v1233_v28  ;;  %v1246_v35 = vsel %vm1242_vm7, %v1233_v28, %v5165_v29 }
  0xb4   : > { %v1263_v36 = vmul.bf16 %v1246_v35, %v5055_v19  ;;  %v1262_v37 = vmul.bf16 %v1245_v34, %v5053_v18 }
  0xb6   : > { %846 = vrot.lane.b32.xlu0 %v380_v45, %s4843_s26  ;;  %848 = vrot.lane.b32.xlu1 %v381_v40, %s4843_s26  ;;  %v548_v38 = vpop.permute.xlu0 %547 }
  0xba   : > { %1705 = vrot.lane.b32.xlu0 %v1667_v47, %s4844_s27  ;;  %1703 = vrot.lane.b32.xlu1 %v1660_v48, %s4844_s27 }
  0xbe   : > { %856 = vrot.lane.b32.xlu0 %v385_v57, %s4843_s26  ;;  %1707 = vrot.lane.b32.xlu1 %v1674_v56, %s4844_s27 }
  0xc2   : > { %852 = vrot.lane.b32.xlu0 %v383_v5, %s4843_s26  ;;  %850 = vrot.lane.b32.xlu1 %v382_v17, %s4843_s26 }
  0xc6   : > { %1709 = vrot.lane.b32.xlu0 %v1681_v14, %s4844_s27  ;;  %854 = vrot.lane.b32.xlu1 %v384_v20, %s4843_s26 }
  0xca   : > { %1711 = vrot.lane.b32.xlu1 %v1688_v24, %s4844_s27  ;;  %1281 = vrot.lane.b32.xlu0 %v1259_v25, %s4845_s5 }
  0xce   : > { %1285 = vrot.lane.b32.xlu0 %v1261_v30, %s4845_s5  ;;  %1283 = vrot.lane.b32.xlu1 %v1260_v31, %s4845_s5  ;;  %v5221_v30 = vsel %vm1109_vm3, 1.0, %v4836_v4 }
  0xd2   : > { %1289 = vrot.lane.b32.xlu0 %v1263_v36, %s4845_s5  ;;  %1287 = vrot.lane.b32.xlu1 %v1262_v37, %s4845_s5  ;;  %v2341_v36 = vrot.slane %v5221_v30, %v4928_v9  ;;  %v2337_v37 = vrot.slane %v5221_v30, %v4922_v6 }
  0xd6   : > { %1270 = vrot.lane.b32.xlu0 %v5071_v32, %s4846_s6  ;;  %1268 = vrot.lane.b32.xlu1 %v5024_v49, %s4846_s6 }
  0xff   : > { %v561_v39 = vpop.permute.xlu0 %560 }
 0x104   : > { %v563_v40 = vpop.permute.xlu1 %562  ;;  %v565_v41 = vpop.permute.xlu0 %564 }
 0x105   : > { %v580_v42 = vsel %vm578_vm8, %v563_v40, %v565_v41  ;;  %v579_v44 = vsel %vm578_vm8, %v561_v39, %v563_v40 }
 0x106   : > { %4391 = vmatprep.subr.msk.bf16.mxu0 %vm594_vm9, %v580_v42  ;;  %v596_v45 = vsel %vm594_vm9, %v579_v44, 0 }
 0x107   : > { %620 = vmatpush1.bf16.msra.mxu0 %v596_v45 }
 0x108   : > { %v567_v46 = vpop.permute.xlu1 %566  ;;  %v569_v47 = vpop.permute.xlu0 %568 }
 0x109   : > { %v582_v48 = vsel %vm578_vm8, %v567_v46, %v569_v47  ;;  %v581_v50 = vsel %vm578_vm8, %v565_v41, %v567_v46  ;;  %v2375_v46 = vpack.c.bf16 %v2341_v36, %v2341_v36 }
 0x10a   : > { %4392 = vmatmul.mubr.msk.bf16.vlgmr.msra.gmra.mrb[0].mxu0 %vm587_vm10, %v548_v38  ;;  %4394 = vmatprep.subr.msk.bf16.mxu1 %vm594_vm9, %v582_v48  ;;  %v602_v51 = vsel %vm594_vm9, %v581_v50, 0 }
 0x10b   : > { %673 = vmatpush1.bf16.msra.mxu1 %v602_v51  ;;  %661 = vmatprep.mubr.bf16.mxu0 %v4841_v52  ;;  %v2349_v51 = vrot.slane %v5221_v30, %v4926_v8 }
 0x10c   : > { %v550_v53 = vpop.permute.xlu1 %549  ;;  %v1237_v56 = vpop.permute.xlu0 %1236 }
 0x10d   : > { %v1247_v26 = vsel %vm1242_vm7, %v5165_v29, %v1237_v56 }
 0x10e   : > { %4395 = vmatmul.mubr.msk.bf16.vlgmr.msra.gmra.mrb[0].mxu1 %vm587_vm10, %v548_v38  ;;  %v1264_v31 = vmul.bf16 %v1247_v26, %v5091_v43 }
 0x10f   : > { %714 = vmatprep.mubr.bf16.mxu1 %v4841_v52 }
 0x110   : > { %v577_v57 = vpop.permute.xlu1 %576  ;;  %v1241_v60 = vpop.permute.xlu0 %1240 }
 0x111   : > { %v1267_v61 = vmul.bf16 %v1241_v60, %v5073_v33 }
 0x112   : > { %4393 = vmatmul.mubr.msk.bf16.gmra.mrb[4].mxu0 %vm587_vm10, %v550_v53 }
 0x113   : > { %1297 = vrot.lane.b32.xlu0 %v1267_v61, %s4845_s5  ;;  %757 = vmatprep.mubr.bf16.mxu0 %v4841_v52 }
 0x114   : > { %v1239_v62 = vpop.permute.xlu1 %1238  ;;  %v571_v63 = vpop.permute.xlu0 %570 }
 0x115   : > { %v1248_v3 = vsel %vm1242_vm7, %v1237_v56, %v1239_v62  ;;  %v583_v15 = vsel %vm578_vm8, %v569_v47, %v571_v63  ;;  %v1249_v34 = vsel %vm1242_vm7, %v1239_v62, %v1241_v60  ;;  %v2374_v47 = vpack.c.bf16 %v2337_v37, %v2337_v37 }
 0x116   : > { %4396 = vmatmul.mubr.msk.bf16.gmra.mrb[4].mxu1 %vm587_vm10, %v550_v53  ;;  %v1265_v5 = vmul.bf16 %v1248_v3, %v5102_v54  ;;  %v608_v21 = vsel %vm594_vm9, %v583_v15, 0  ;;  %v1266_v42 = vmul.bf16 %v1249_v34, %v5104_v55  ;;  %v2345_v56 = vrot.slane %v5221_v30, %v4924_v7 }
 0x117   : > { %810 = vmatprep.mubr.bf16.mxu1 %v4841_v52  ;;  %v2390_v62 = vpack.i.b16 %v2375_v46, %v2375_v46  ;;  %v2377_v15 = vpack.c.bf16 %v2349_v51, %v2349_v51 }
 0x118   : > { %v573_v1 = vpop.permute.xlu1 %572  ;;  %1293 = vrot.lane.b32.xlu0 %v1265_v5, %s4845_s5  ;;  %v575_v16 = vpop.permute.xlu0 %574 }
 0x119   : > { %v585_v17 = vsel %vm578_vm8, %v573_v1, %v575_v16  ;;  %v584_v14 = vsel %vm578_vm8, %v571_v63, %v573_v1  ;;  %v586_v20 = vsel %vm578_vm8, %v575_v16, %v577_v57  ;;  %v2383_v63 = vpack.i.b16 %v2374_v47, %v2374_v47 }
 0x11a   : > { %4397 = vmatprep.subr.msk.bf16.mxu0 %vm594_vm9, %v584_v14  ;;  %4400 = vmatprep.subr.msk.bf16.mxu1 %vm594_vm9, %v586_v20  ;;  %v614_v22 = vsel %vm594_vm9, %v585_v17, 0  ;;  %v2376_v1 = vpack.c.bf16 %v2345_v56, %v2345_v56  ;;  %v2353_v16 = vrot.slane %v5221_v30, %v4930_v10  ;;  %v2404_v26 = vpack.i.b16 %v2377_v15, %v2377_v15 }
 0x11b   : > { %726 = vmatpush1.bf16.msra.mxu0 %v608_v21  ;;  %779 = vmatpush1.bf16.msra.mxu1 %v614_v22  ;;  %v2395_v22 = vrot.slane %v2390_v62, %v4922_v6  ;;  %v2365_v56 = vrot.slane %v5221_v30, %v4936_v13 }
 0x11c   : > { %v841_v23 = vpop.permute.xlu1 %840  ;;  %v1698_v24 = vpop.permute.xlu0 %1697  ;;  %v2409_v34 = vrot.slane %v2404_v26, %v4922_v6 }
 0x11d   : > { %v1730_v25 = vmul.bf16 0, %v1698_v24 }
 0x11e   : > { %4398 = vmatmul.mubr.msk.bf16.vlgmr.msra.gmra.mrb[8].mxu0 %vm587_vm10, %v548_v38  ;;  %4401 = vmatmul.mubr.msk.bf16.vlgmr.msra.gmra.mrb[8].mxu1 %vm587_vm10, %v548_v38 }
 0x11f   : > { %1752 = vrot.lane.b32.xlu1 %v1730_v25, %s4847_s7  ;;  %767 = vmatprep.mubr.bf16.mxu0 %v4841_v52 }
 0x120   : > { %v1700_v27 = vpop.permute.xlu1 %1699  ;;  %v1702_v28 = vpop.permute.xlu0 %1701  ;;  %820 = vmatprep.mubr.bf16.mxu1 %v4841_v52 }
 0x121   : > { %v1714_v29 = vsel %vm1713_vm11, %v1698_v24, %v1700_v27  ;;  %v1715_v44 = vsel %vm1713_vm11, %v1700_v27, %v1702_v28  ;;  %v2397_v27 = vpack.i.b16 %v2376_v1, %v2376_v1 }
 0x122   : > { %v1731_v35 = vmul.bf16 %v1714_v29, %v5041_v58  ;;  %v1732_v60 = vmul.bf16 %v1715_v44, %v5043_v59 }
 0x123   : > { %1291 = vrot.lane.b32.xlu1 %v1264_v31, %s4845_s5 }
 0x124   : > { %1754 = vrot.lane.b32.xlu0 %v1731_v35, %s4847_s7  ;;  %v843_v38 = vpop.permute.xlu0 %842  ;;  %v845_v39 = vpop.permute.xlu1 %844  ;;  %v2402_v35 = vrot.slane %v2397_v27, %v4922_v6 }
 0x125   : > { %v859_v40 = vsel %vm858_vm12, %v841_v23, %v843_v38  ;;  %v860_v41 = vsel %vm858_vm12, %v843_v38, %v845_v39  ;;  %v2388_v23 = vrot.slane %v2383_v63, %v4922_v6 }
 0x126   : > { %4399 = vmatmul.mubr.msk.bf16.gmra.mrb[12].mxu0 %vm587_vm10, %v550_v53  ;;  %4402 = vmatmul.mubr.msk.bf16.gmra.mrb[12].mxu1 %vm587_vm10, %v550_v53  ;;  %v874_v45 = vsel %vm594_vm9, %v859_v40, 0  ;;  %v2357_v40 = vrot.slane %v5221_v30, %v4932_v11 }
 0x127   : > { %4403 = vmatprep.subr.msk.bf16.mxu0 %vm594_vm9, %v860_v41  ;;  %1295 = vrot.lane.b32.xlu1 %v1266_v42, %s4845_s5 }
 0x128   : > { %898 = vmatpush1.bf16.msra.mxu0 %v874_v45  ;;  %v847_v48 = vpop.permute.xlu0 %846  ;;  %v849_v50 = vpop.permute.xlu1 %848  ;;  %929 = vmatprep.mubr.bf16.mxu0 %v4841_v52  ;;  %v2379_v51 = vpack.c.bf16 %v2357_v40, %v2357_v40 }
 0x129   : > { %v861_v53 = vsel %vm858_vm12, %v845_v39, %v847_v48  ;;  %v862_v57 = vsel %vm858_vm12, %v847_v48, %v849_v50  ;;  %982 = vmatprep.mubr.bf16.mxu1 %v4841_v52  ;;  %v2361_v48 = vrot.slane %v5221_v30, %v4934_v12 }
 0x12a   : > { %4406 = vmatprep.subr.msk.bf16.mxu1 %vm594_vm9, %v862_v57  ;;  %v880_v61 = vsel %vm594_vm9, %v861_v53, 0 }
 0x12b   : > { %1756 = vrot.lane.b32.xlu1 %v1732_v60, %s4847_s7  ;;  %951 = vmatpush1.bf16.msra.mxu1 %v880_v61  ;;  %v5307_v61 = vsel %vm2801_vm14, 1.0, %v4836_v4  ;;  %v2380_v63 = vpack.c.bf16 %v2361_v48, %v2361_v48 }
 0x12c   : > { %v1706_v3 = vpop.permute.xlu0 %1705  ;;  %v1704_v5 = vpop.permute.xlu1 %1703  ;;  %v2812_v1 = vrot.slane %v5307_v61, %v4928_v9  ;;  %v2820_v27 = vrot.slane %v5307_v61, %v4926_v8 }
 0x12d   : > { %v1716_v17 = vsel %vm1713_vm11, %v1702_v28, %v1704_v5  ;;  %v1717_v14 = vsel %vm1713_vm11, %v1704_v5, %v1706_v3  ;;  %v2378_v28 = vpack.c.bf16 %v2353_v16, %v2353_v16  ;;  %v2381_v5 = vpack.c.bf16 %v2365_v56, %v2365_v56 }
 0x12e   : > { %v1734_v20 = vmul.bf16 %v1717_v14, %v5055_v19  ;;  %v1733_v21 = vmul.bf16 %v1716_v17, %v5053_v18  ;;  %4404 = vmatmul.mubr.msk.bf16.vlgmr.msra.gmra.mrb[0].mxu0 %vm587_vm10, %v5024_v49  ;;  %4407 = vmatmul.mubr.msk.bf16.vlgmr.msra.gmra.mrb[0].mxu1 %vm587_vm10, %v5024_v49  ;;  %v2808_v16 = vrot.slane %v5307_v61, %v4922_v6 }
 0x12f   : > { %939 = vmatprep.mubr.bf16.mxu0 %v4841_v52  ;;  %992 = vmatprep.mubr.bf16.mxu1 %v4841_v52  ;;  %v2411_v36 = vpack.i.b16 %v2378_v28, %v2378_v28  ;;  %v2432_v26 = vpack.i.b16 %v2381_v5, %v2381_v5  ;;  %v2816_v28 = vrot.slane %v5307_v61, %v4924_v7 }
 0x130   : > { %v857_v24 = vpop.permute.xlu0 %856  ;;  %1760 = vrot.lane.b32.xlu1 %v1734_v20, %s4847_s7  ;;  %1758 = vrot.lane.b32.xlu0 %v1733_v21, %s4847_s7  ;;  %v1708_v25 = vpop.permute.xlu1 %1707  ;;  %v2832_v5 = vrot.slane %v5307_v61, %v4934_v12 }
 0x131   : > { %v2416_v44 = vrot.slane %v2411_v36, %v4922_v6 }
 0x134   : > { %v853_v29 = vpop.permute.xlu0 %852  ;;  %2448 = vrot.lane.b32.xlu1 %v2395_v22, %s4847_s7  ;;  %2446 = vrot.lane.b32.xlu0 %v2388_v23, %s4847_s7  ;;  %v851_v31 = vpop.permute.xlu1 %850  ;;  %v2425_v23 = vpack.i.b16 %v2380_v63, %v2380_v63 }
 0x135   : > { %v863_v37 = vsel %vm858_vm12, %v849_v50, %v851_v31  ;;  %v864_v38 = vsel %vm858_vm12, %v851_v31, %v853_v29  ;;  %v1718_v50 = vsel %vm1713_vm11, %v1706_v3, %v1708_v25  ;;  %v2418_v3 = vpack.i.b16 %v2379_v51, %v2379_v51 }
 0x136   : > { %4409 = vmatprep.subr.msk.bf16.mxu0 %vm594_vm9, %v864_v38  ;;  %v886_v39 = vsel %vm594_vm9, %v863_v37, 0  ;;  %4405 = vmatmul.mubr.msk.bf16.gmra.mrb[4].mxu0 %vm587_vm10, %v5071_v32  ;;  %v1735_v62 = vmul.bf16 %v1718_v50, %v5091_v43  ;;  %v2846_v31 = vpack.c.bf16 %v2812_v1, %v2812_v1 }
 0x137   : > { %1004 = vmatpush1.bf16.msra.mxu0 %v886_v39  ;;  %4408 = vmatmul.mubr.msk.bf16.gmra.mrb[4].mxu1 %vm587_vm10, %v5071_v32  ;;  %v2430_v39 = vrot.slane %v2425_v23, %v4922_v6 }
 0x138   : > { %v1710_v41 = vpop.permute.xlu0 %1709  ;;  %2452 = vrot.lane.b32.xlu1 %v2409_v34, %s4847_s7  ;;  %2450 = vrot.lane.b32.xlu0 %v2402_v35, %s4847_s7  ;;  %v855_v42 = vpop.permute.xlu1 %854  ;;  %v2845_v34 = vpack.c.bf16 %v2808_v16, %v2808_v16 }
 0x139   : > { %v865_v45 = vsel %vm858_vm12, %v853_v29, %v855_v42  ;;  %v866_v46 = vsel %vm858_vm12, %v855_v42, %v857_v24  ;;  %1035 = vmatprep.mubr.bf16.mxu0 %v4841_v52  ;;  %1088 = vmatprep.mubr.bf16.mxu1 %v4841_v52  ;;  %v1719_v30 = vsel %vm1713_vm11, %v1708_v25, %v1710_v41 }
 0x13a   : > { %4412 = vmatprep.subr.msk.bf16.mxu1 %vm594_vm9, %v866_v46  ;;  %v892_v47 = vsel %vm594_vm9, %v865_v45, 0  ;;  %v1736_v22 = vmul.bf16 %v1719_v30, %v5102_v54  ;;  %v2423_v25 = vrot.slane %v2418_v3, %v4922_v6  ;;  %v2847_v42 = vpack.c.bf16 %v2816_v28, %v2816_v28 }
 0x13b   : > { %1057 = vmatpush1.bf16.msra.mxu1 %v892_v47  ;;  %v2437_v45 = vrot.slane %v2432_v26, %v4922_v6  ;;  %v2861_v46 = vpack.i.b16 %v2846_v31, %v2846_v31  ;;  %v2854_v47 = vpack.i.b16 %v2845_v34, %v2845_v34 }
 0x13c   : > { %1739 = vrot.lane.b32.xlu1 %v5024_v49, %s4848_s8  ;;  %2454 = vrot.lane.b32.xlu0 %v2416_v44, %s4847_s7  ;;  %v1712_v53 = vpop.permute.xlu1 %1711  ;;  %v1282_v57 = vpop.permute.xlu0 %1281  ;;  %v2824_v44 = vrot.slane %v5307_v61, %v4930_v10  ;;  %v2868_v50 = vpack.i.b16 %v2847_v42, %v2847_v42 }
 0x13d   : > { %v1720_v60 = vsel %vm1713_vm11, %v1710_v41, %v1712_v53  ;;  %v1738_v29 = vmul.bf16 %v1712_v53, %v5073_v33  ;;  %v2848_v41 = vpack.c.bf16 %v2820_v27, %v2820_v27  ;;  %v2866_v53 = vrot.slane %v2861_v46, %v4922_v6 }
 0x13e   : > { %4410 = vmatmul.mubr.msk.bf16.vlgmr.msra.gmra.mrb[8].mxu0 %vm587_vm10, %v5024_v49  ;;  %v1737_v15 = vmul.bf16 %v1720_v60, %v5104_v55  ;;  %v2849_v51 = vpack.c.bf16 %v2824_v44, %v2824_v44  ;;  %v2828_v60 = vrot.slane %v5307_v61, %v4932_v11  ;;  %v2873_v63 = vrot.slane %v2868_v50, %v4922_v6 }
 0x13f   : > { %4413 = vmatmul.mubr.msk.bf16.vlgmr.msra.gmra.mrb[8].mxu1 %vm587_vm10, %v5024_v49  ;;  %1045 = vmatprep.mubr.bf16.mxu0 %v4841_v52  ;;  %v2875_v48 = vpack.i.b16 %v2848_v41, %v2848_v41  ;;  %v5413_v44 = vsel %vm2800_vm13, 1.0, %v4836_v4 }
 0x140   : > { %1741 = vrot.lane.b32.xlu0 %v5071_v32, %s4848_s8  ;;  %1762 = vrot.lane.b32.xlu1 %v1735_v62, %s4847_s7  ;;  %v1286_v17 = vpop.permute.xlu0 %1285  ;;  %v1284_v14 = vpop.permute.xlu1 %1283  ;;  %v2882_v30 = vpack.i.b16 %v2849_v51, %v2849_v51  ;;  %v2850_v3 = vpack.c.bf16 %v2828_v60, %v2828_v60  ;;  %v3277_v46 = vrot.slane %v5413_v44, %v4922_v6 }
 0x141   : > { %v1300_v20 = vsel %vm1299_vm15, %v1282_v57, %v1284_v14  ;;  %v1301_v21 = vsel %vm1299_vm15, %v1284_v14, %v1286_v17  ;;  %1098 = vmatprep.mubr.bf16.mxu1 %v4841_v52  ;;  %v2859_v57 = vrot.slane %v2854_v47, %v4922_v6  ;;  %v2880_v62 = vrot.slane %v2875_v48, %v4922_v6 }
 0x142   : > { %4416 = vmatprep.subr.msk.bf16.mxu0 %vm594_vm9, %v1301_v21  ;;  %v1315_v24 = vsel %vm594_vm9, %v1300_v20, 0  ;;  %v2887_v1 = vrot.slane %v2882_v30, %v4922_v6  ;;  %v2889_v16 = vpack.i.b16 %v2850_v3, %v2850_v3 }
 0x143   : > { %1339 = vmatpush1.bf16.msra.mxu0 %v1315_v24 }
 0x144   : > { %1764 = vrot.lane.b32.xlu0 %v1736_v22, %s4847_s7  ;;  %1766 = vrot.lane.b32.xlu1 %v1737_v15, %s4847_s7  ;;  %v5337_v35 = vpop.permute.xlu0 %1289  ;;  %v1288_v36 = vpop.permute.xlu1 %1287  ;;  %v2836_v15 = vrot.slane %v5307_v61, %v4936_v13  ;;  %v2894_v61 = vrot.slane %v2889_v16, %v4922_v6 }
 0x145   : > { %v1302_v37 = vsel %vm1299_vm15, %v1286_v17, %v1288_v36  ;;  %v1303_v38 = vsel %vm1299_vm15, %v1288_v36, %v5337_v35  ;;  %v2851_v17 = vpack.c.bf16 %v2832_v5, %v2832_v5 }
 0x146   : > { %v1321_v40 = vsel %vm594_vm9, %v1302_v37, 0  ;;  %4419 = vmatprep.subr.msk.bf16.mxu1 %vm594_vm9, %v1303_v38  ;;  %4411 = vmatmul.mubr.msk.bf16.gmra.mrb[12].mxu0 %vm587_vm10, %v5071_v32  ;;  %v2852_v14 = vpack.c.bf16 %v2836_v15, %v2836_v15 }
 0x147   : > { %1392 = vmatpush1.bf16.msra.mxu1 %v1321_v40  ;;  %1370 = vmatprep.mubr.bf16.mxu0 %v4841_v52  ;;  %v2896_v21 = vpack.i.b16 %v2851_v17, %v2851_v17 }
 0x148   : > { %1768 = vrot.lane.b32.xlu0 %v1738_v29, %s4847_s7  ;;  %2456 = vrot.lane.b32.xlu1 %v2423_v25, %s4847_s7  ;;  %v5356_v56 = vpop.permute.xlu1 %1268  ;;  %v1271_v20 = vpop.permute.xlu0 %1270  ;;  %v2903_v22 = vpack.i.b16 %v2852_v14, %v2852_v14 }
 0x149   : > { %4414 = vmatmul.mubr.msk.bf16.gmra.mrb[12].mxu1 %vm587_vm10, %v5071_v32  ;;  %v2901_v23 = vrot.slane %v2896_v21, %v4922_v6  ;;  %v3293_v21 = vrot.slane %v5413_v44, %v4930_v10 }
 0x14a   : > { %1423 = vmatprep.mubr.bf16.mxu1 %v4841_v52  ;;  %v2908_v24 = vrot.slane %v2903_v22, %v4922_v6 }
 0x14c   : > { %2458 = vrot.lane.b32.xlu0 %v2430_v39, %s4847_s7  ;;  %2460 = vrot.lane.b32.xlu1 %v2437_v45, %s4847_s7 }
 0x14e   : > { %4417 = vmatmul.mubr.msk.bf16.vlgmr.msra.gmra.mrb[0].mxu0 %vm587_vm10, %v5356_v56 }
 0x14f   : > { %1380 = vmatprep.mubr.bf16.mxu0 %v4841_v52 }
 0x150   : > { %2919 = vrot.lane.b32.xlu1 %v2866_v53, %s4845_s5  ;;  %2917 = vrot.lane.b32.xlu0 %v2859_v57, %s4845_s5  ;;  %v3281_v57 = vrot.slane %v5413_v44, %v4928_v9 }
 0x151   : > { %4420 = vmatmul.mubr.msk.bf16.vlgmr.msra.gmra.mrb[0].mxu1 %vm587_vm10, %v5356_v56 }
 0x152   : > { %1433 = vmatprep.mubr.bf16.mxu1 %v4841_v52 }
 0x154   : > { %2923 = vrot.lane.b32.xlu1 %v2880_v62, %s4845_s5  ;;  %2921 = vrot.lane.b32.xlu0 %v2873_v63, %s4845_s5  ;;  %v3285_v63 = vrot.slane %v5413_v44, %v4924_v7 }
 0x156   : > { %4418 = vmatmul.mubr.msk.bf16.gmra.mrb[4].mxu0 %vm587_vm10, %v1271_v20  ;;  %v3316_v14 = vpack.c.bf16 %v3285_v63, %v3285_v63  ;;  %v3297_v63 = vrot.slane %v5413_v44, %v4932_v11 }
 0x157   : > { %1476 = vmatprep.mubr.bf16.mxu0 %v4841_v52 }
 0x158   : > { %2053 = vrot.lane.b32.xlu1 %v5024_v49, %s4837_s28  ;;  %2925 = vrot.lane.b32.xlu0 %v2887_v1, %s4845_s5  ;;  %v3315_v1 = vpack.c.bf16 %v3281_v57, %v3281_v57  ;;  %v3301_v57 = vrot.slane %v5413_v44, %v4934_v12 }
 0x159   : > { %4421 = vmatmul.mubr.msk.bf16.gmra.mrb[4].mxu1 %vm587_vm10, %v1271_v20 }
 0x15a   : > { %1529 = vmatprep.mubr.bf16.mxu1 %v4841_v52 }
 0x15c   : > { %2055 = vrot.lane.b32.xlu0 %v5071_v32, %s4837_s28  ;;  %2927 = vrot.lane.b32.xlu1 %v2894_v61, %s4845_s5  ;;  %v3289_v61 = vrot.slane %v5413_v44, %v4926_v8 }
 0x160   : > { %2929 = vrot.lane.b32.xlu0 %v2901_v23, %s4845_s5  ;;  %2931 = vrot.lane.b32.xlu1 %v2908_v24, %s4845_s5 }
 0x185   : > { %v1298_v25 = vpop.permute.xlu0 %1297 }
 0x18a   : > { %v1294_v27 = vpop.permute.xlu0 %1293 }
 0x191   : > { %v1753_v26 = vpop.permute.xlu1 %1752 }
 0x195   : > { %v1292_v28 = vpop.permute.xlu1 %1291 }
 0x196   : > { %v1304_v29 = vsel %vm1299_vm15, %v5337_v35, %v1292_v28  ;;  %v1305_v31 = vsel %vm1299_vm15, %v1292_v28, %v1294_v27  ;;  %v1755_v36 = vpop.permute.xlu0 %1754 }
 0x197   : > { %v1327_v34 = vsel %vm594_vm9, %v1304_v29, 0  ;;  %4422 = vmatprep.subr.msk.bf16.mxu0 %vm594_vm9, %v1305_v31  ;;  %v1771_v35 = vsel %vm1770_vm0, %v1753_v26, %v1755_v36  ;;  %v3330_v26 = vpack.i.b16 %v3315_v1, %v3315_v1  ;;  %v3337_v29 = vpack.i.b16 %v3316_v14, %v3316_v14 }
 0x198   : > { %1445 = vmatpush1.bf16.msra.mxu0 %v1327_v34  ;;  %v1786_v45 = vsel %vm594_vm9, %v1771_v35, 0  ;;  %v3317_v31 = vpack.c.bf16 %v3289_v61, %v3289_v61  ;;  %v3318_v34 = vpack.c.bf16 %v3293_v21, %v3293_v21  ;;  %v2064_v14 = vsel %vm594_vm9, %v5041_v58, 0 }
 0x199   : > { %v1296_v37 = vpop.permute.xlu1 %1295  ;;  %v3342_v35 = vrot.slane %v3337_v29, %v4922_v6  ;;  %v3305_v61 = vrot.slane %v5413_v44, %v4936_v13  ;;  %v2070_v44 = vsel %vm594_vm9, %v5053_v18, 0 }
 0x19a   : > { %v1306_v38 = vsel %vm1299_vm15, %v1294_v27, %v1296_v37  ;;  %v1307_v39 = vsel %vm1299_vm15, %v1296_v37, %v1298_v25 }
 0x19b   : > { %v1333_v40 = vsel %vm594_vm9, %v1306_v38, 0  ;;  %4423 = vmatmul.mubr.msk.bf16.vlgmr.msra.gmra.mrb[8].mxu0 %vm587_vm10, %v5356_v56  ;;  %4425 = vmatprep.subr.msk.bf16.mxu1 %vm594_vm9, %v1307_v39  ;;  %v3335_v38 = vrot.slane %v3330_v26, %v4922_v6 }
 0x19c   : > { %1498 = vmatpush1.bf16.msra.mxu1 %v1333_v40  ;;  %1486 = vmatprep.mubr.bf16.mxu0 %v4841_v52 }
 0x19d   : > { %v1757_v41 = vpop.permute.xlu1 %1756 }
 0x19e   : > { %v1772_v42 = vsel %vm1770_vm0, %v1755_v36, %v1757_v41 }
 0x19f   : > { %4426 = vmatmul.mubr.msk.bf16.vlgmr.msra.gmra.mrb[8].mxu1 %vm587_vm10, %v5356_v56  ;;  %4429 = vmatprep.subr.msk.bf16.mxu0 %vm594_vm9, %v1772_v42  ;;  %v3314_v56 = vpack.c.bf16 %v3277_v46, %v3277_v46  ;;  %v3351_v42 = vpack.i.b16 %v3318_v34, %v3318_v34  ;;  %v5519_v34 = vsel %vm3740_vm1, 1.0, %v4836_v4 }
 0x1a0   : > { %1810 = vmatpush1.bf16.msra.mxu0 %v1786_v45  ;;  %1539 = vmatprep.mubr.bf16.mxu1 %v4841_v52  ;;  %v3751_v4 = vrot.slane %v5519_v34, %v4928_v9 }
 0x1a1   : > { %v3323_v15 = vpack.i.b16 %v3314_v56, %v3314_v56 }
 0x1a2   : > { %v1759_v47 = vpop.permute.xlu0 %1758  ;;  %v1761_v48 = vpop.permute.xlu1 %1760  ;;  %v3785_v9 = vpack.c.bf16 %v3751_v4, %v3751_v4 }
 0x1a3   : > { %v1773_v50 = vsel %vm1770_vm0, %v1757_v41, %v1759_v47  ;;  %v1774_v51 = vsel %vm1770_vm0, %v1759_v47, %v1761_v48  ;;  %4424 = vmatmul.mubr.msk.bf16.gmra.mrb[12].mxu0 %vm587_vm10, %v1271_v20  ;;  %v3328_v25 = vrot.slane %v3323_v15, %v4922_v6  ;;  %v3344_v41 = vpack.i.b16 %v3317_v31, %v3317_v31 }
 0x1a4   : > { %v1792_v53 = vsel %vm594_vm9, %v1773_v50, 0  ;;  %4432 = vmatprep.subr.msk.bf16.mxu1 %vm594_vm9, %v1774_v51  ;;  %1841 = vmatprep.mubr.bf16.mxu0 %v4841_v52  ;;  %v3356_v51 = vrot.slane %v3351_v42, %v4922_v6  ;;  %v3320_v15 = vpack.c.bf16 %v3301_v57, %v3301_v57 }
 0x1a5   : > { %1863 = vmatpush1.bf16.msra.mxu1 %v1792_v53  ;;  %v3349_v50 = vrot.slane %v3344_v41, %v4922_v6 }
 0x1a6   : > { %v2447_v60 = vpop.permute.xlu0 %2446  ;;  %v2449_v62 = vpop.permute.xlu1 %2448 }
 0x1a7   : > { %v2478_v30 = vmul.bf16 %v2447_v60, %v5041_v58  ;;  %v2462_v3 = vsel %vm1770_vm0, %v2447_v60, %v2449_v62  ;;  %4427 = vmatmul.mubr.msk.bf16.gmra.mrb[12].mxu1 %vm587_vm10, %v1271_v20 }
 0x1a8   : > { %v2479_v5 = vmul.bf16 %v2462_v3, %v5043_v59  ;;  %1894 = vmatprep.mubr.bf16.mxu1 %v4841_v52 }
 0x1a9   : > { %2500 = vrot.lane.b32.xlu0 %v2478_v30, %s4844_s27 }
 0x1aa   : > { %v2451_v16 = vpop.permute.xlu0 %2450  ;;  %2502 = vrot.lane.b32.xlu1 %v2479_v5, %s4844_s27  ;;  %v2453_v17 = vpop.permute.xlu1 %2452 }
 0x1ab   : > { %v2463_v20 = vsel %vm1770_vm0, %v2449_v62, %v2451_v16  ;;  %v2464_v22 = vsel %vm1770_vm0, %v2451_v16, %v2453_v17 }
 0x1ac   : > { %v2480_v23 = vmul.bf16 %v2463_v20, %v5053_v18  ;;  %v2481_v24 = vmul.bf16 %v2464_v22, %v5055_v19 }
 0x1ae   : > { %v2455_v27 = vpop.permute.xlu0 %2454  ;;  %2504 = vrot.lane.b32.xlu0 %v2480_v23, %s4844_s27  ;;  %2506 = vrot.lane.b32.xlu1 %v2481_v24, %s4844_s27  ;;  %v1740_v28 = vpop.permute.xlu1 %1739  ;;  %v3365_v24 = vpack.i.b16 %v3320_v15, %v3320_v15  ;;  %v3763_v15 = vrot.slane %v5519_v34, %v4930_v10 }
 0x1af   : > { %v2465_v36 = vsel %vm1770_vm0, %v2453_v17, %v2455_v27  ;;  %4430 = vmatmul.mubr.msk.bf16.vlgmr.msra.gmra.mrb[0].mxu0 %vm587_vm10, %v1740_v28  ;;  %4433 = vmatmul.mubr.msk.bf16.vlgmr.msra.gmra.mrb[0].mxu1 %vm587_vm10, %v1740_v28  ;;  %v3319_v17 = vpack.c.bf16 %v3297_v63, %v3297_v63 }
 0x1b0   : > { %v2482_v37 = vmul.bf16 %v2465_v36, %v5091_v43  ;;  %1851 = vmatprep.mubr.bf16.mxu0 %v4841_v52  ;;  %1904 = vmatprep.mubr.bf16.mxu1 %v4841_v52  ;;  %v3370_v36 = vrot.slane %v3365_v24, %v4922_v6 }
 0x1b1   : > { %v3358_v31 = vpack.i.b16 %v3319_v17, %v3319_v17 }
 0x1b2   : > { %v5457_v39 = vpop.permute.xlu0 %1741  ;;  %2508 = vrot.lane.b32.xlu0 %v2482_v37, %s4844_s27  ;;  %3386 = vrot.lane.b32.xlu1 %v3328_v25, %s4842_s17  ;;  %v1763_v40 = vpop.permute.xlu1 %1762 }
 0x1b3   : > { %v1775_v45 = vsel %vm1770_vm0, %v1761_v48, %v1763_v40  ;;  %v3363_v2 = vrot.slane %v3358_v31, %v4922_v6  ;;  %v3775_v31 = vrot.slane %v5519_v34, %v4936_v13 }
 0x1b4   : > { %v1798_v48 = vsel %vm594_vm9, %v1775_v45, 0 }
 0x1b5   : > { %v3791_v4 = vpack.c.bf16 %v3775_v31, %v3775_v31 }
 0x1b6   : > { %v1765_v46 = vpop.permute.xlu0 %1764  ;;  %3388 = vrot.lane.b32.xlu0 %v3335_v38, %s4842_s17  ;;  %3390 = vrot.lane.b32.xlu1 %v3342_v35, %s4842_s17  ;;  %v1767_v47 = vpop.permute.xlu1 %1766 }
 0x1b7   : > { %v1776_v53 = vsel %vm1770_vm0, %v1763_v40, %v1765_v46  ;;  %4431 = vmatmul.mubr.msk.bf16.gmra.mrb[4].mxu0 %vm587_vm10, %v5457_v39  ;;  %4434 = vmatmul.mubr.msk.bf16.gmra.mrb[4].mxu1 %vm587_vm10, %v5457_v39  ;;  %v1777_v56 = vsel %vm1770_vm0, %v1765_v46, %v1767_v47  ;;  %v3747_v40 = vrot.slane %v5519_v34, %v4922_v6 }
 0x1b8   : > { %4435 = vmatprep.subr.msk.bf16.mxu0 %vm594_vm9, %v1776_v53  ;;  %1947 = vmatprep.mubr.bf16.mxu0 %v4841_v52  ;;  %v1804_v3 = vsel %vm594_vm9, %v1777_v56, 0  ;;  %v2076_v56 = vsel %vm594_vm9, %v5091_v43, 0 }
 0x1b9   : > { %1916 = vmatpush1.bf16.msra.mxu0 %v1798_v48  ;;  %2000 = vmatprep.mubr.bf16.mxu1 %v4841_v52 }
 0x1ba   : > { %v1769_v60 = vpop.permute.xlu0 %1768  ;;  %3392 = vrot.lane.b32.xlu0 %v3349_v50, %s4842_s17  ;;  %3394 = vrot.lane.b32.xlu1 %v3356_v51, %s4842_s17  ;;  %v2457_v62 = vpop.permute.xlu1 %2456  ;;  %v3759_v50 = vrot.slane %v5519_v34, %v4926_v8  ;;  %v3755_v51 = vrot.slane %v5519_v34, %v4924_v7  ;;  %v3800_v7 = vpack.i.b16 %v3785_v9, %v3785_v9 }
 0x1bb   : > { %v1778_v30 = vsel %vm1770_vm0, %v1767_v47, %v1769_v60  ;;  %4441 = vmatprep.subr.msk.bf16.mxu0 %vm594_vm9, %v5043_v59  ;;  %v2466_v5 = vsel %vm1770_vm0, %v2455_v27, %v2457_v62  ;;  %v3784_v47 = vpack.c.bf16 %v3747_v40, %v3747_v40  ;;  %v2082_v60 = vsel %vm594_vm9, %v5104_v55, 0 }
 0x1bc   : > { %4438 = vmatprep.subr.msk.bf16.mxu1 %vm594_vm9, %v1778_v30  ;;  %v2483_v22 = vmul.bf16 %v2466_v5, %v5102_v54  ;;  %v3787_v63 = vpack.c.bf16 %v3759_v50, %v3759_v50  ;;  %v3786_v30 = vpack.c.bf16 %v3755_v51, %v3755_v51 }
 0x1bd   : > { %1969 = vmatpush1.bf16.msra.mxu1 %v1804_v3 }
 0x1be   : > { %v2459_v1 = vpop.permute.xlu0 %2458  ;;  %2487 = vrot.lane.b32.xlu0 %v5024_v49, %s4849_s9  ;;  %2489 = vrot.lane.b32.xlu1 %v5071_v32, %s4849_s9  ;;  %v2461_v16 = vpop.permute.xlu1 %2460 }
 0x1bf   : > { %v2467_v21 = vsel %vm1770_vm0, %v2457_v62, %v2459_v1  ;;  %4436 = vmatmul.mubr.msk.bf16.vlgmr.msra.gmra.mrb[8].mxu0 %vm587_vm10, %v1740_v28  ;;  %v2468_v20 = vsel %vm1770_vm0, %v2459_v1, %v2461_v16  ;;  %4444 = vmatprep.subr.msk.bf16.mxu1 %vm594_vm9, %v5055_v19  ;;  %v2486_v26 = vmul.bf16 0, %v2461_v16  ;;  %v3793_v62 = vpack.i.b16 %v3784_v47, %v3784_v47 }
 0x1c0   : > { %v2484_v23 = vmul.bf16 %v2467_v21, %v5104_v55  ;;  %4439 = vmatmul.mubr.msk.bf16.vlgmr.msra.gmra.mrb[8].mxu1 %vm587_vm10, %v1740_v28  ;;  %1957 = vmatprep.mubr.bf16.mxu0 %v4841_v52  ;;  %v2485_v25 = vmul.bf16 %v2468_v20, %v5073_v33  ;;  %v3321_v28 = vpack.c.bf16 %v3305_v61, %v3305_v61 }
 0x1c1   : > { %2010 = vmatprep.mubr.bf16.mxu1 %v4841_v52  ;;  %2088 = vmatpush1.bf16.msra.mxu0 %v2064_v14  ;;  %v3805_v16 = vrot.slane %v3800_v7, %v4922_v6  ;;  %v3798_v17 = vrot.slane %v3793_v62, %v4922_v6  ;;  %v3814_v14 = vpack.i.b16 %v3787_v63, %v3787_v63 }
 0x1c2   : > { %2512 = vrot.lane.b32.xlu1 %v2484_v23, %s4844_s27  ;;  %2510 = vrot.lane.b32.xlu0 %v2483_v22, %s4844_s27  ;;  %v2920_v27 = vpop.permute.xlu1 %2919  ;;  %v2918_v29 = vpop.permute.xlu0 %2917  ;;  %v3372_v38 = vpack.i.b16 %v3321_v28, %v3321_v28  ;;  %v3807_v61 = vpack.i.b16 %v3786_v30, %v3786_v30  ;;  %v3788_v21 = vpack.c.bf16 %v3763_v15, %v3763_v15 }
 0x1c3   : > { %2141 = vmatpush1.bf16.msra.mxu1 %v2070_v44  ;;  %4447 = vmatprep.subr.msk.bf16.mxu0 %vm594_vm9, %v5102_v54  ;;  %v2949_v35 = vmul.bf16 %v2918_v29, %v5041_v58  ;;  %v3819_v10 = vrot.slane %v3814_v14, %v4922_v6  ;;  %v3767_v44 = vrot.slane %v5519_v34, %v4932_v11 }
 0x1c4   : > { %4450 = vmatprep.subr.msk.bf16.mxu1 %vm594_vm9, %v5073_v33  ;;  %v3377_v41 = vrot.slane %v3372_v38, %v4922_v6  ;;  %v3812_v20 = vrot.slane %v3807_v61, %v4922_v6  ;;  %v3821_v22 = vpack.i.b16 %v3788_v21, %v3788_v21  ;;  %v3771_v11 = vrot.slane %v5519_v34, %v4934_v12 }
 0x1c6   : > { %2516 = vrot.lane.b32.xlu1 %v2486_v26, %s4844_s27  ;;  %2514 = vrot.lane.b32.xlu0 %v2485_v25, %s4844_s27  ;;  %v2924_v0 = vpop.permute.xlu1 %2923  ;;  %v2922_v37 = vpop.permute.xlu0 %2921  ;;  %v3826_v24 = vrot.slane %v3821_v22, %v4922_v6 }
 0x1c7   : > { %4437 = vmatmul.mubr.msk.bf16.gmra.mrb[12].mxu0 %vm587_vm10, %v5457_v39  ;;  %v2934_v42 = vsel %vm1299_vm15, %v2920_v27, %v2922_v37  ;;  %v2935_v57 = vsel %vm1299_vm15, %v2922_v37, %v2924_v0  ;;  %v3790_v37 = vpack.c.bf16 %v3771_v11, %v3771_v11 }
 0x1c8   : > { %4440 = vmatmul.mubr.msk.bf16.gmra.mrb[12].mxu1 %vm587_vm10, %v5457_v39  ;;  %2119 = vmatprep.mubr.bf16.mxu0 %v4841_v52  ;;  %v2933_v39 = vsel %vm1299_vm15, %v2918_v29, %v2920_v27  ;;  %v2951_v48 = vmul.bf16 %v2934_v42, %v5053_v18  ;;  %v2952_v3 = vmul.bf16 %v2935_v57, %v5055_v19 }
 0x1c9   : > { %2172 = vmatprep.mubr.bf16.mxu1 %v4841_v52  ;;  %v2950_v53 = vmul.bf16 %v2933_v39, %v5043_v59  ;;  %v3789_v29 = vpack.c.bf16 %v3767_v44, %v3767_v44  ;;  %v3835_v40 = vpack.i.b16 %v3790_v37, %v3790_v37 }
 0x1ca   : > { %3398 = vrot.lane.b32.xlu1 %v3370_v36, %s4842_s17  ;;  %3396 = vrot.lane.b32.xlu0 %v3363_v2, %s4842_s17  ;;  %v2054_v45 = vpop.permute.xlu1 %2053  ;;  %v2926_v46 = vpop.permute.xlu0 %2925 }
 0x1cb   : > { %v2936_v8 = vsel %vm1299_vm15, %v2924_v0, %v2926_v46  ;;  %v3828_v0 = vpack.i.b16 %v3789_v29, %v3789_v29 }
 0x1cc   : > { %v2953_v5 = vmul.bf16 %v2936_v8, %v5091_v43 }
 0x1cd   : > { %v3833_v34 = vrot.slane %v3828_v0, %v4922_v6 }
 0x1ce   : > { %2971 = vrot.lane.b32.xlu1 %v2949_v35, %s4839_s30  ;;  %3400 = vrot.lane.b32.xlu0 %v3377_v41, %s4842_s17  ;;  %v2056_v1 = vpop.permute.xlu0 %2055  ;;  %v2928_v23 = vpop.permute.xlu1 %2927  ;;  %v3842_v35 = vpack.i.b16 %v3791_v4, %v3791_v4  ;;  %v3840_v41 = vrot.slane %v3835_v40, %v4922_v6 }
 0x1cf   : > { %4442 = vmatmul.mubr.msk.bf16.vlgmr.msra.gmra.mrb[0].mxu0 %vm587_vm10, %v2054_v45  ;;  %v2937_v27 = vsel %vm1299_vm15, %v2926_v46, %v2928_v23 }
 0x1d0   : > { %4445 = vmatmul.mubr.msk.bf16.vlgmr.msra.gmra.mrb[0].mxu1 %vm587_vm10, %v2054_v45  ;;  %2129 = vmatprep.mubr.bf16.mxu0 %v4841_v52  ;;  %v2954_v2 = vmul.bf16 %v2937_v27, %v5102_v54  ;;  %v3847_v39 = vrot.slane %v3842_v35, %v4922_v6 }
 0x1d1   : > { %2182 = vmatprep.mubr.bf16.mxu1 %v4841_v52  ;;  %2194 = vmatpush1.bf16.msra.mxu0 %v2076_v56 }
 0x1d2   : > { %2975 = vrot.lane.b32.xlu1 %v2951_v48, %s4839_s30  ;;  %2973 = vrot.lane.b32.xlu0 %v2950_v53, %s4839_s30  ;;  %v2930_v25 = vpop.permute.xlu0 %2929  ;;  %v2932_v26 = vpop.permute.xlu1 %2931 }
 0x1d3   : > { %2247 = vmatpush1.bf16.msra.mxu1 %v2082_v60  ;;  %v2938_v28 = vsel %vm1299_vm15, %v2928_v23, %v2930_v25  ;;  %v2939_v36 = vsel %vm1299_vm15, %v2930_v25, %v2932_v26  ;;  %v2957_v13 = vmul.bf16 0, %v2932_v26 }
 0x1d4   : > { %v2955_v38 = vmul.bf16 %v2938_v28, %v5104_v55  ;;  %v2956_v12 = vmul.bf16 %v2939_v36, %v5073_v33 }
 0x1d6   : > { %2979 = vrot.lane.b32.xlu1 %v2953_v5, %s4839_s30  ;;  %2977 = vrot.lane.b32.xlu0 %v2952_v3, %s4839_s30 }
 0x1d7   : > { %4443 = vmatmul.mubr.msk.bf16.gmra.mrb[4].mxu0 %vm587_vm10, %v2056_v1 }
 0x1d8   : > { %4446 = vmatmul.mubr.msk.bf16.gmra.mrb[4].mxu1 %vm587_vm10, %v2056_v1  ;;  %2225 = vmatprep.mubr.bf16.mxu0 %v4841_v52 }
 0x1d9   : > { %2278 = vmatprep.mubr.bf16.mxu1 %v4841_v52 }
 0x1da   : > { %3858 = vrot.lane.b32.xlu1 %v3805_v16, %s4843_s26  ;;  %3856 = vrot.lane.b32.xlu0 %v3798_v17, %s4843_s26 }
 0x1de   : > { %3862 = vrot.lane.b32.xlu1 %v3819_v10, %s4843_s26  ;;  %3860 = vrot.lane.b32.xlu0 %v3812_v20, %s4843_s26 }
 0x1df   : > { %4448 = vmatmul.mubr.msk.bf16.vlgmr.msra.gmra.mrb[8].mxu0 %vm587_vm10, %v2054_v45 }
 0x1e0   : > { %4451 = vmatmul.mubr.msk.bf16.vlgmr.msra.gmra.mrb[8].mxu1 %vm587_vm10, %v2054_v45  ;;  %2235 = vmatprep.mubr.bf16.mxu0 %v4841_v52 }
 0x1e1   : > { %2288 = vmatprep.mubr.bf16.mxu1 %v4841_v52 }
 0x1e2   : > { %2958 = vrot.lane.b32.xlu1 %v5024_v49, %s4850_s10  ;;  %3864 = vrot.lane.b32.xlu0 %v3826_v24, %s4843_s26 }
 0x1e6   : > { %2960 = vrot.lane.b32.xlu0 %v5071_v32, %s4850_s10  ;;  %2981 = vrot.lane.b32.xlu1 %v2954_v2, %s4839_s30 }
 0x1e7   : > { %4449 = vmatmul.mubr.msk.bf16.gmra.mrb[12].mxu0 %vm587_vm10, %v2056_v1 }
 0x1e8   : > { %4452 = vmatmul.mubr.msk.bf16.gmra.mrb[12].mxu1 %vm587_vm10, %v2056_v1  ;;  %2588 = vmatprep.mubr.bf16.mxu0 %v4841_v52 }
 0x1e9   : > { %2641 = vmatprep.mubr.bf16.mxu1 %v4841_v52 }
 0x1ea   : > { %2983 = vrot.lane.b32.xlu0 %v2955_v38, %s4839_s30  ;;  %2985 = vrot.lane.b32.xlu1 %v2956_v12, %s4839_s30 }
 0x1ee   : > { %2987 = vrot.lane.b32.xlu0 %v2957_v13, %s4839_s30  ;;  %3866 = vrot.lane.b32.xlu1 %v3833_v34, %s4843_s26  ;;  %s4851_s30 = smov 100  }
 0x1f2   : > { %3868 = vrot.lane.b32.xlu0 %v3840_v41, %s4843_s26  ;;  %3870 = vrot.lane.b32.xlu1 %v3847_v39, %s4843_s26 }
 0x21b   : > { %v2501_v42 = vpop.permute.xlu0 %2500 }
 0x21c   : > { %v2503_v45 = vpop.permute.xlu1 %2502 }
 0x21d   : > { %v2518_v46 = vsel %vm1713_vm11, %v2501_v42, %v2503_v45 }
 0x21e   : > { %v2533_v51 = vsel %vm594_vm9, %v2518_v46, 0 }
 0x220   : > { %v2505_v9 = vpop.permute.xlu0 %2504  ;;  %v2507_v47 = vpop.permute.xlu1 %2506 }
 0x221   : > { %v2519_v50 = vsel %vm1713_vm11, %v2503_v45, %v2505_v9  ;;  %v2520_v53 = vsel %vm1713_vm11, %v2505_v9, %v2507_v47 }
 0x222   : > { %4454 = vmatprep.subr.msk.bf16.mxu0 %vm594_vm9, %v2519_v50  ;;  %v2539_v8 = vsel %vm594_vm9, %v2520_v53, 0 }
 0x223   : > { %2557 = vmatpush1.bf16.msra.mxu0 %v2533_v51 }
 0x224   : > { %v2509_v6 = vpop.permute.xlu0 %2508  ;;  %v3387_v48 = vpop.permute.xlu1 %3386 }
 0x225   : > { %v2521_v56 = vsel %vm1713_vm11, %v2507_v47, %v2509_v6  ;;  %v3418_v57 = vmul.bf16 %v3387_v48, %v5041_v58 }
 0x226   : > { %4457 = vmatprep.subr.msk.bf16.mxu1 %vm594_vm9, %v2521_v56 }
 0x227   : > { %2610 = vmatpush1.bf16.msra.mxu1 %v2539_v8  ;;  %3440 = vrot.lane.b32.xlu0 %v3418_v57, %s4837_s28 }
 0x228   : > { %v3389_v7 = vpop.permute.xlu0 %3388  ;;  %v3391_v60 = vpop.permute.xlu1 %3390 }
 0x229   : > { %v3402_v62 = vsel %vm578_vm8, %v3387_v48, %v3389_v7  ;;  %v3403_v63 = vsel %vm578_vm8, %v3389_v7, %v3391_v60 }
 0x22a   : > { %v3419_v30 = vmul.bf16 %v3402_v62, %v5043_v59  ;;  %v3420_v3 = vmul.bf16 %v3403_v63, %v5053_v18 }
 0x22c   : > { %v3393_v5 = vpop.permute.xlu0 %3392  ;;  %3442 = vrot.lane.b32.xlu1 %v3419_v30, %s4837_s28  ;;  %3444 = vrot.lane.b32.xlu0 %v3420_v3, %s4837_s28  ;;  %v3395_v15 = vpop.permute.xlu1 %3394 }
 0x22d   : > { %v3404_v1 = vsel %vm578_vm8, %v3391_v60, %v3393_v5  ;;  %v3405_v16 = vsel %vm578_vm8, %v3393_v5, %v3395_v15 }
 0x22e   : > { %v3421_v17 = vmul.bf16 %v3404_v1, %v5055_v19  ;;  %v3422_v14 = vmul.bf16 %v3405_v16, %v5091_v43 }
 0x230   : > { %v2488_v61 = vpop.permute.xlu0 %2487  ;;  %3446 = vrot.lane.b32.xlu1 %v3421_v17, %s4837_s28  ;;  %3448 = vrot.lane.b32.xlu0 %v3422_v14, %s4837_s28  ;;  %v2490_v21 = vpop.permute.xlu1 %2489 }
 0x231   : > { %4455 = vmatmul.mubr.msk.bf16.vlgmr.msra.gmra.mrb[0].mxu0 %vm587_vm10, %v2488_v61  ;;  %4458 = vmatmul.mubr.msk.bf16.vlgmr.msra.gmra.mrb[0].mxu1 %vm587_vm10, %v2488_v61 }
 0x232   : > { %2598 = vmatprep.mubr.bf16.mxu0 %v4841_v52  ;;  %2651 = vmatprep.mubr.bf16.mxu1 %v4841_v52 }
 0x234   : > { %v2511_v10 = vpop.permute.xlu0 %2510  ;;  %v2513_v20 = vpop.permute.xlu1 %2512  ;;  %3427 = vrot.lane.b32.xlu1 %v5024_v49, %s4851_s30  ;;  %3429 = vrot.lane.b32.xlu0 %v5071_v32, %s4851_s30 }
 0x235   : > { %v2522_v22 = vsel %vm1713_vm11, %v2509_v6, %v2511_v10  ;;  %v2523_v23 = vsel %vm1713_vm11, %v2511_v10, %v2513_v20 }
 0x236   : > { %v2545_v44 = vsel %vm594_vm9, %v2522_v22, 0  ;;  %4460 = vmatprep.subr.msk.bf16.mxu0 %vm594_vm9, %v2523_v23 }
 0x237   : > { %2663 = vmatpush1.bf16.msra.mxu0 %v2545_v44 }
 0x238   : > { %v2515_v24 = vpop.permute.xlu0 %2514  ;;  %v2517_v25 = vpop.permute.xlu1 %2516 }
 0x239   : > { %v2524_v26 = vsel %vm1713_vm11, %v2513_v20, %v2515_v24  ;;  %v2525_v27 = vsel %vm1713_vm11, %v2515_v24, %v2517_v25  ;;  %4456 = vmatmul.mubr.msk.bf16.gmra.mrb[4].mxu0 %vm587_vm10, %v2490_v21  ;;  %4459 = vmatmul.mubr.msk.bf16.gmra.mrb[4].mxu1 %vm587_vm10, %v2490_v21 }
 0x23a   : > { %v2551_v29 = vsel %vm594_vm9, %v2524_v26, 0  ;;  %4463 = vmatprep.subr.msk.bf16.mxu1 %vm594_vm9, %v2525_v27  ;;  %2694 = vmatprep.mubr.bf16.mxu0 %v4841_v52 }
 0x23b   : > { %2716 = vmatpush1.bf16.msra.mxu1 %v2551_v29  ;;  %2747 = vmatprep.mubr.bf16.mxu1 %v4841_v52 }
 0x23c   : > { %v3397_v11 = vpop.permute.xlu0 %3396  ;;  %v3399_v31 = vpop.permute.xlu1 %3398 }
 0x23d   : > { %v3406_v28 = vsel %vm578_vm8, %v3395_v15, %v3397_v11  ;;  %v3407_v36 = vsel %vm578_vm8, %v3397_v11, %v3399_v31 }
 0x23e   : > { %v3423_v2 = vmul.bf16 %v3406_v28, %v5102_v54  ;;  %v3424_v0 = vmul.bf16 %v3407_v36, %v5104_v55 }
 0x240   : > { %v3401_v37 = vpop.permute.xlu0 %3400  ;;  %3450 = vrot.lane.b32.xlu1 %v3423_v2, %s4837_s28  ;;  %3452 = vrot.lane.b32.xlu0 %v3424_v0, %s4837_s28  ;;  %v2972_v38 = vpop.permute.xlu1 %2971 }
 0x241   : > { %v3408_v12 = vsel %vm578_vm8, %v3399_v31, %v3401_v37  ;;  %v3426_v4 = vmul.bf16 0, %v3401_v37  ;;  %4461 = vmatmul.mubr.msk.bf16.vlgmr.msra.gmra.mrb[8].mxu0 %vm587_vm10, %v2488_v61  ;;  %4464 = vmatmul.mubr.msk.bf16.vlgmr.msra.gmra.mrb[8].mxu1 %vm587_vm10, %v2488_v61 }
 0x242   : > { %v3425_v13 = vmul.bf16 %v3408_v12, %v5073_v33  ;;  %2704 = vmatprep.mubr.bf16.mxu0 %v4841_v52  ;;  %2757 = vmatprep.mubr.bf16.mxu1 %v4841_v52 }
 0x244   : > { %v2974_v34 = vpop.permute.xlu0 %2973  ;;  %3454 = vrot.lane.b32.xlu1 %v3425_v13, %s4837_s28  ;;  %3456 = vrot.lane.b32.xlu0 %v3426_v4, %s4837_s28  ;;  %v2976_v40 = vpop.permute.xlu1 %2975  ;;  %s4852_s28 = smov 96  }
 0x245   : > { %v2989_v35 = vsel %vm1242_vm7, %v2972_v38, %v2974_v34  ;;  %v2990_v41 = vsel %vm1242_vm7, %v2974_v34, %v2976_v40 }
 0x246   : > { %v3004_v39 = vsel %vm594_vm9, %v2989_v35, 0  ;;  %4467 = vmatprep.subr.msk.bf16.mxu0 %vm594_vm9, %v2990_v41 }
 0x247   : > { %3028 = vmatpush1.bf16.msra.mxu0 %v3004_v39 }
 0x248   : > { %v2978_v42 = vpop.permute.xlu0 %2977  ;;  %v2980_v45 = vpop.permute.xlu1 %2979 }
 0x249   : > { %v2991_v46 = vsel %vm1242_vm7, %v2976_v40, %v2978_v42  ;;  %v2992_v9 = vsel %vm1242_vm7, %v2978_v42, %v2980_v45  ;;  %4462 = vmatmul.mubr.msk.bf16.gmra.mrb[12].mxu0 %vm587_vm10, %v2490_v21  ;;  %4465 = vmatmul.mubr.msk.bf16.gmra.mrb[12].mxu1 %vm587_vm10, %v2490_v21 }
 0x24a   : > { %v3010_v47 = vsel %vm594_vm9, %v2991_v46, 0  ;;  %4470 = vmatprep.subr.msk.bf16.mxu1 %vm594_vm9, %v2992_v9  ;;  %3059 = vmatprep.mubr.bf16.mxu0 %v4841_v52 }
 0x24b   : > { %3081 = vmatpush1.bf16.msra.mxu1 %v3010_v47  ;;  %3112 = vmatprep.mubr.bf16.mxu1 %v4841_v52 }
 0x24c   : > { %v3857_v50 = vpop.permute.xlu0 %3856  ;;  %v3859_v51 = vpop.permute.xlu1 %3858 }
 0x24d   : > { %v3888_v53 = vmul.bf16 %v3857_v50, %v5041_v58  ;;  %v3872_v6 = vsel %vm858_vm12, %v3857_v50, %v3859_v51 }
 0x24e   : > { %v3889_v48 = vmul.bf16 %v3872_v6, %v5043_v59 }
 0x24f   : > { %3910 = vrot.lane.b32.xlu1 %v3888_v53, %s4838_s29 }
 0x250   : > { %v3861_v56 = vpop.permute.xlu0 %3860  ;;  %3912 = vrot.lane.b32.xlu0 %v3889_v48, %s4838_s29  ;;  %v3863_v57 = vpop.permute.xlu1 %3862 }
 0x251   : > { %v3873_v8 = vsel %vm858_vm12, %v3859_v51, %v3861_v56  ;;  %v3874_v7 = vsel %vm858_vm12, %v3861_v56, %v3863_v57 }
 0x252   : > { %v3890_v60 = vmul.bf16 %v3873_v8, %v5053_v18  ;;  %v3891_v62 = vmul.bf16 %v3874_v7, %v5055_v19 }
 0x254   : > { %v3865_v63 = vpop.permute.xlu0 %3864  ;;  %3914 = vrot.lane.b32.xlu1 %v3890_v60, %s4838_s29  ;;  %3916 = vrot.lane.b32.xlu0 %v3891_v62, %s4838_s29  ;;  %v2959_v58 = vpop.permute.xlu1 %2958 }
 0x255   : > { %v3875_v59 = vsel %vm858_vm12, %v3863_v57, %v3865_v63  ;;  %4468 = vmatmul.mubr.msk.bf16.vlgmr.msra.gmra.mrb[0].mxu0 %vm587_vm10, %v2959_v58  ;;  %4471 = vmatmul.mubr.msk.bf16.vlgmr.msra.gmra.mrb[0].mxu1 %vm587_vm10, %v2959_v58 }
 0x256   : > { %v3892_v30 = vmul.bf16 %v3875_v59, %v5091_v43  ;;  %3069 = vmatprep.mubr.bf16.mxu0 %v4841_v52  ;;  %3122 = vmatprep.mubr.bf16.mxu1 %v4841_v52 }
 0x258   : > { %v2961_v18 = vpop.permute.xlu0 %2960  ;;  %3918 = vrot.lane.b32.xlu1 %v3892_v30, %s4838_s29  ;;  %v2982_v19 = vpop.permute.xlu1 %2981  ;;  %3897 = vrot.lane.b32.xlu0 %v5024_v49, %s4852_s28 }
 0x259   : > { %v2993_v3 = vsel %vm1242_vm7, %v2980_v45, %v2982_v19 }
 0x25a   : > { %v3016_v43 = vsel %vm594_vm9, %v2993_v3, 0 }
 0x25c   : > { %v2984_v5 = vpop.permute.xlu0 %2983  ;;  %v2986_v15 = vpop.permute.xlu1 %2985  ;;  %3899 = vrot.lane.b32.xlu1 %v5071_v32, %s4852_s28 }
 0x25d   : > { %v2994_v1 = vsel %vm1242_vm7, %v2982_v19, %v2984_v5  ;;  %4469 = vmatmul.mubr.msk.bf16.gmra.mrb[4].mxu0 %vm587_vm10, %v2961_v18  ;;  %4472 = vmatmul.mubr.msk.bf16.gmra.mrb[4].mxu1 %vm587_vm10, %v2961_v18  ;;  %v2995_v49 = vsel %vm1242_vm7, %v2984_v5, %v2986_v15 }
 0x25e   : > { %4473 = vmatprep.subr.msk.bf16.mxu0 %vm594_vm9, %v2994_v1  ;;  %3165 = vmatprep.mubr.bf16.mxu0 %v4841_v52  ;;  %v3022_v61 = vsel %vm594_vm9, %v2995_v49, 0 }
 0x25f   : > { %3134 = vmatpush1.bf16.msra.mxu0 %v3016_v43  ;;  %3218 = vmatprep.mubr.bf16.mxu1 %v4841_v52 }
 0x260   : > { %v2988_v16 = vpop.permute.xlu0 %2987  ;;  %v3867_v17 = vpop.permute.xlu1 %3866 }
 0x261   : > { %v2996_v32 = vsel %vm1242_vm7, %v2986_v15, %v2988_v16  ;;  %v3876_v14 = vsel %vm858_vm12, %v3865_v63, %v3867_v17 }
 0x262   : > { %v3893_v21 = vmul.bf16 %v3876_v14, %v5102_v54  ;;  %4476 = vmatprep.subr.msk.bf16.mxu1 %vm594_vm9, %v2996_v32 }
 0x263   : > { %3187 = vmatpush1.bf16.msra.mxu1 %v3022_v61 }
 0x264   : > { %v3869_v10 = vpop.permute.xlu0 %3868  ;;  %3920 = vrot.lane.b32.xlu0 %v3893_v21, %s4838_s29  ;;  %v3871_v20 = vpop.permute.xlu1 %3870 }
 0x265   : > { %v3877_v22 = vsel %vm858_vm12, %v3867_v17, %v3869_v10  ;;  %v3878_v23 = vsel %vm858_vm12, %v3869_v10, %v3871_v20  ;;  %4474 = vmatmul.mubr.msk.bf16.vlgmr.msra.gmra.mrb[8].mxu0 %vm587_vm10, %v2959_v58  ;;  %v3896_v54 = vmul.bf16 0, %v3871_v20 }
 0x266   : > { %v3894_v44 = vmul.bf16 %v3877_v22, %v5104_v55  ;;  %v3895_v24 = vmul.bf16 %v3878_v23, %v5073_v33  ;;  %4477 = vmatmul.mubr.msk.bf16.vlgmr.msra.gmra.mrb[8].mxu1 %vm587_vm10, %v2959_v58  ;;  %3175 = vmatprep.mubr.bf16.mxu0 %v4841_v52 }
 0x267   : > { %3228 = vmatprep.mubr.bf16.mxu1 %v4841_v52 }
 0x268   : > { %3922 = vrot.lane.b32.xlu1 %v3894_v44, %s4838_s29  ;;  %3924 = vrot.lane.b32.xlu0 %v3895_v24, %s4838_s29 }
 0x26c   : > { %3926 = vrot.lane.b32.xlu1 %v3896_v54, %s4838_s29  ;;  %s185_s29 = sand.u32 1, %s4826_s15   ;;  %s4510_s15 = sshll.u32 (%p4903_p4), %s4891_s18, 6 }
 0x26d   : > { %4475 = vmatmul.mubr.msk.bf16.gmra.mrb[12].mxu0 %vm587_vm10, %v2961_v18  ;;  %s4386_s11 = sshll.u32 %s185_s29, 8  ;;  %s5835_s17 = scalar_lea.vmem (%p4903_p4), %s5912_s4, %s4510_s15 }
 0x26e   : > { %4478 = vmatmul.mubr.msk.bf16.gmra.mrb[12].mxu1 %vm587_vm10, %v2961_v18  ;;  %3528 = vmatprep.mubr.bf16.mxu0 %v4841_v52  ;;  %s5792_s12 = scalar_lea.vmem [#allocation2], %s4386_s11 }
 0x26f   : > { %3581 = vmatprep.mubr.bf16.mxu1 %v4841_v52 }
 0x299   : > { %v3441_v33 = vpop.permute.xlu0 %3440 }
 0x29e   : > { %v3445_v55 = vpop.permute.xlu0 %3444  ;;  %v3443_v25 = vpop.permute.xlu1 %3442 }
 0x29f   : > { %v3458_v26 = vsel %vm519_vm5, %v3441_v33, %v3443_v25  ;;  %v3459_v27 = vsel %vm519_vm5, %v3443_v25, %v3445_v55 }
 0x2a0   : > { %v3473_v29 = vsel %vm594_vm9, %v3458_v26, 0  ;;  %4480 = vmatprep.subr.msk.bf16.mxu0 %vm594_vm9, %v3459_v27 }
 0x2a1   : > { %3497 = vmatpush1.bf16.msra.mxu0 %v3473_v29 }
 0x2a2   : > { %v3449_v11 = vpop.permute.xlu0 %3448  ;;  %v3447_v31 = vpop.permute.xlu1 %3446 }
 0x2a3   : > { %v3460_v28 = vsel %vm519_vm5, %v3445_v55, %v3447_v31  ;;  %v3461_v36 = vsel %vm519_vm5, %v3447_v31, %v3449_v11 }
 0x2a4   : > { %v3479_v2 = vsel %vm594_vm9, %v3460_v28, 0  ;;  %4483 = vmatprep.subr.msk.bf16.mxu1 %vm594_vm9, %v3461_v36 }
 0x2a5   : > { %3550 = vmatpush1.bf16.msra.mxu1 %v3479_v2 }
 0x2a6   : > { %v3428_v0 = vpop.permute.xlu1 %3427  ;;  %v3430_v37 = vpop.permute.xlu0 %3429 }
 0x2a7   : > { %4481 = vmatmul.mubr.msk.bf16.vlgmr.msra.gmra.mrb[0].mxu0 %vm587_vm10, %v3428_v0 }
 0x2a8   : > { %4484 = vmatmul.mubr.msk.bf16.vlgmr.msra.gmra.mrb[0].mxu1 %vm587_vm10, %v3428_v0  ;;  %3538 = vmatprep.mubr.bf16.mxu0 %v4841_v52 }
 0x2a9   : > { %3591 = vmatprep.mubr.bf16.mxu1 %v4841_v52 }
 0x2af   : > { %4482 = vmatmul.mubr.msk.bf16.gmra.mrb[4].mxu0 %vm587_vm10, %v3430_v37 }
 0x2b0   : > { %4485 = vmatmul.mubr.msk.bf16.gmra.mrb[4].mxu1 %vm587_vm10, %v3430_v37  ;;  %3634 = vmatprep.mubr.bf16.mxu0 %v4841_v52 }
 0x2b1   : > { %3687 = vmatprep.mubr.bf16.mxu1 %v4841_v52 }
 0x2b2   : > { %v3453_v38 = vpop.permute.xlu0 %3452  ;;  %v3451_v12 = vpop.permute.xlu1 %3450 }
 0x2b3   : > { %v3462_v4 = vsel %vm519_vm5, %v3449_v11, %v3451_v12  ;;  %v3463_v13 = vsel %vm519_vm5, %v3451_v12, %v3453_v38 }
 0x2b4   : > { %v3485_v34 = vsel %vm594_vm9, %v3462_v4, 0  ;;  %4486 = vmatprep.subr.msk.bf16.mxu0 %vm594_vm9, %v3463_v13 }
 0x2b5   : > { %3603 = vmatpush1.bf16.msra.mxu0 %v3485_v34 }
 0x2b6   : > { %v3457_v40 = vpop.permute.xlu0 %3456  ;;  %v3455_v35 = vpop.permute.xlu1 %3454 }
 0x2b7   : > { %v3464_v41 = vsel %vm519_vm5, %v3453_v38, %v3455_v35  ;;  %v3465_v39 = vsel %vm519_vm5, %v3455_v35, %v3457_v40 }
 0x2b8   : > { %v3491_v42 = vsel %vm594_vm9, %v3464_v41, 0  ;;  %4487 = vmatmul.mubr.msk.bf16.vlgmr.msra.gmra.mrb[8].mxu0 %vm587_vm10, %v3428_v0  ;;  %4489 = vmatprep.subr.msk.bf16.mxu1 %vm594_vm9, %v3465_v39 }
 0x2b9   : > { %3656 = vmatpush1.bf16.msra.mxu1 %v3491_v42  ;;  %3644 = vmatprep.mubr.bf16.mxu0 %v4841_v52 }
 0x2bc   : > { %4490 = vmatmul.mubr.msk.bf16.vlgmr.msra.gmra.mrb[8].mxu1 %vm587_vm10, %v3428_v0 }
 0x2bd   : > { %3697 = vmatprep.mubr.bf16.mxu1 %v4841_v52 }
 0x2c0   : > { %4488 = vmatmul.mubr.msk.bf16.gmra.mrb[12].mxu0 %vm587_vm10, %v3430_v37 }
 0x2c1   : > { %v3911_v45 = vpop.permute.xlu1 %3910  ;;  %3998 = vmatprep.mubr.bf16.mxu0 %v4841_v52 }
 0x2c2   : > { %v3913_v46 = vpop.permute.xlu0 %3912 }
 0x2c3   : > { %v3928_v9 = vsel %vm360_vm6, %v3911_v45, %v3913_v46 }
 0x2c4   : > { %4491 = vmatmul.mubr.msk.bf16.gmra.mrb[12].mxu1 %vm587_vm10, %v3430_v37  ;;  %v3943_v53 = vsel %vm594_vm9, %v3928_v9, 0 }
 0x2c5   : > { %4051 = vmatprep.mubr.bf16.mxu1 %v4841_v52 }
 0x2c6   : > { %v3917_v47 = vpop.permute.xlu0 %3916  ;;  %v3915_v50 = vpop.permute.xlu1 %3914 }
 0x2c7   : > { %v3929_v51 = vsel %vm360_vm6, %v3913_v46, %v3915_v50  ;;  %v3930_v6 = vsel %vm360_vm6, %v3915_v50, %v3917_v47 }
 0x2c8   : > { %4493 = vmatprep.subr.msk.bf16.mxu0 %vm594_vm9, %v3929_v51  ;;  %v3949_v8 = vsel %vm594_vm9, %v3930_v6, 0 }
 0x2c9   : > { %3967 = vmatpush1.bf16.msra.mxu0 %v3943_v53 }
 0x2ca   : > { %v3919_v48 = vpop.permute.xlu1 %3918  ;;  %v3898_v56 = vpop.permute.xlu0 %3897 }
 0x2cb   : > { %v3931_v57 = vsel %vm360_vm6, %v3917_v47, %v3919_v48 }
 0x2cc   : > { %4494 = vmatmul.mubr.msk.bf16.vlgmr.msra.gmra.mrb[0].mxu0 %vm587_vm10, %v3898_v56  ;;  %4496 = vmatprep.subr.msk.bf16.mxu1 %vm594_vm9, %v3931_v57 }
 0x2cd   : > { %4020 = vmatpush1.bf16.msra.mxu1 %v3949_v8  ;;  %4008 = vmatprep.mubr.bf16.mxu0 %v4841_v52 }
 0x2ce   : > { %v3900_v7 = vpop.permute.xlu1 %3899 }
 0x2d0   : > { %4497 = vmatmul.mubr.msk.bf16.vlgmr.msra.gmra.mrb[0].mxu1 %vm587_vm10, %v3898_v56 }
 0x2d1   : > { %4061 = vmatprep.mubr.bf16.mxu1 %v4841_v52 }
 0x2d4   : > { %4495 = vmatmul.mubr.msk.bf16.gmra.mrb[4].mxu0 %vm587_vm10, %v3900_v7 }
 0x2d5   : > { %4104 = vmatprep.mubr.bf16.mxu0 %v4841_v52 }
 0x2d6   : > { %v3921_v60 = vpop.permute.xlu0 %3920 }
 0x2d7   : > { %v3932_v62 = vsel %vm360_vm6, %v3919_v48, %v3921_v60 }
 0x2d8   : > { %4498 = vmatmul.mubr.msk.bf16.gmra.mrb[4].mxu1 %vm587_vm10, %v3900_v7  ;;  %v3955_v30 = vsel %vm594_vm9, %v3932_v62, 0 }
 0x2d9   : > { %4157 = vmatprep.mubr.bf16.mxu1 %v4841_v52 }
 0x2da   : > { %v3925_v63 = vpop.permute.xlu0 %3924  ;;  %v3923_v58 = vpop.permute.xlu1 %3922 }
 0x2db   : > { %v3933_v59 = vsel %vm360_vm6, %v3921_v60, %v3923_v58  ;;  %v3934_v18 = vsel %vm360_vm6, %v3923_v58, %v3925_v63 }
 0x2dc   : > { %4499 = vmatprep.subr.msk.bf16.mxu0 %vm594_vm9, %v3933_v59  ;;  %v3961_v5 = vsel %vm594_vm9, %v3934_v18, 0 }
 0x2dd   : > { %4073 = vmatpush1.bf16.msra.mxu0 %v3955_v30 }
 0x2de   : > { %v3927_v19 = vpop.permute.xlu1 %3926 }
 0x2df   : > { %v3935_v3 = vsel %vm360_vm6, %v3925_v63, %v3927_v19 }
 0x2e0   : > { %4500 = vmatmul.mubr.msk.bf16.vlgmr.msra.gmra.mrb[8].mxu0 %vm587_vm10, %v3898_v56  ;;  %4502 = vmatprep.subr.msk.bf16.mxu1 %vm594_vm9, %v3935_v3 }
 0x2e1   : > { %4126 = vmatpush1.bf16.msra.mxu1 %v3961_v5  ;;  %4114 = vmatprep.mubr.bf16.mxu0 %v4841_v52 }
 0x2e4   : > { %4503 = vmatmul.mubr.msk.bf16.vlgmr.msra.gmra.mrb[8].mxu1 %vm587_vm10, %v3898_v56 }
 0x2e5   : > { %4167 = vmatprep.mubr.bf16.mxu1 %v4841_v52 }
 0x2e8   : > { %4501 = vmatmul.mubr.msk.bf16.gmra.mrb[12].mxu0 %vm587_vm10, %v3900_v7 }
 0x2ec   : > { %4504 = vmatmul.mubr.msk.bf16.gmra.mrb[12].mxu1 %vm587_vm10, %v3900_v7 }
 0x39f   : > { %v4000_v15 = vpop.f32.mrb[0].mxu0 }
 0x3a0   : > { %4210 = vst [vmem:[%s5792_s12] sm:$0xff] %v4000_v15  ;;  %v4002_v52 = vpop.f32.mrb[1].mxu0 }
 0x3a1   : > { %4211 = vst [vmem:[%s5792_s12 + $0x8] sm:$0xff] %v4002_v52  ;;  %v4004_v1 = vpop.f32.mrb[2].mxu0 }
 0x3a2   : > { %4218 = vst [vmem:[%s5792_s12 + $0x40] sm:$0xff] %v4004_v1  ;;  %v4006_v43 = vpop.f32.mrb[3].mxu0 }
 0x3a3   : > { %4219 = vst [vmem:[%s5792_s12 + $0x48] sm:$0xff] %v4006_v43  ;;  %v4053_v49 = vpop.f32.mrb[0].mxu1 }
 0x3a4   : > { %4212 = vst [vmem:[%s5792_s12 + $0x10] sm:$0xff] %v4053_v49  ;;  %v4055_v16 = vpop.f32.mrb[1].mxu1 }
 0x3a5   : > { %4213 = vst [vmem:[%s5792_s12 + $0x18] sm:$0xff] %v4055_v16  ;;  %v4057_v17 = vpop.f32.mrb[2].mxu1 }
 0x3a6   : > { %4220 = vst [vmem:[%s5792_s12 + $0x50] sm:$0xff] %v4057_v17  ;;  %v4059_v32 = vpop.f32.mrb[3].mxu1 }
 0x3a7   : > { %4221 = vst [vmem:[%s5792_s12 + $0x58] sm:$0xff] %v4059_v32  ;;  %v4010_v14 = vpop.f32.mrb[4].mxu0  ;;  %v4264_v12 = vld [vmem:[%s5792_s12] sm:$0xff] (%p4903_p4) }
 0x3a8   : > { %4226 = vst [vmem:[%s5792_s12 + $0x80] sm:$0xff] %v4010_v14  ;;  %v4012_v61 = vpop.f32.mrb[5].mxu0  ;;  %v4266_v4 = vld [vmem:[%s5792_s12 + $0x8] sm:$0xff] (%p4903_p4)  ;;  %4265 = vst [vmem:[%s5835_s17] sm:$0xff] (%p4903_p4), %v4264_v12 }
 0x3a9   : > { %4227 = vst [vmem:[%s5792_s12 + $0x88] sm:$0xff] %v4012_v61  ;;  %v4014_v21 = vpop.f32.mrb[6].mxu0  ;;  %4267 = vst [vmem:[%s5835_s17 + $0x8] sm:$0xff] (%p4903_p4), %v4266_v4  ;;  %v4280_v42 = vld [vmem:[%s5792_s12 + $0x40] sm:$0xff] (%p4903_p4) }
 0x3aa   : > { %4234 = vst [vmem:[%s5792_s12 + $0xc0] sm:$0xff] %v4014_v21  ;;  %v4016_v10 = vpop.f32.mrb[7].mxu0  ;;  %4281 = vst [vmem:[%s5835_s17 + $0x100] sm:$0xff] (%p4903_p4), %v4280_v42  ;;  %v4282_v45 = vld [vmem:[%s5792_s12 + $0x48] sm:$0xff] (%p4903_p4) }
 0x3ab   : > { %4235 = vst [vmem:[%s5792_s12 + $0xc8] sm:$0xff] %v4016_v10  ;;  %v4063_v20 = vpop.f32.mrb[4].mxu1  ;;  %v4268_v13 = vld [vmem:[%s5792_s12 + $0x10] sm:$0xff] (%p4903_p4)  ;;  %4283 = vst [vmem:[%s5835_s17 + $0x108] sm:$0xff] (%p4903_p4), %v4282_v45 }
 0x3ac   : > { %4228 = vst [vmem:[%s5792_s12 + $0x90] sm:$0xff] %v4063_v20  ;;  %v4065_v22 = vpop.f32.mrb[5].mxu1  ;;  %v4270_v34 = vld [vmem:[%s5792_s12 + $0x18] sm:$0xff] (%p4903_p4)  ;;  %4269 = vst [vmem:[%s5835_s17 + $0x10] sm:$0xff] (%p4903_p4), %v4268_v13 }
 0x3ad   : > { %4229 = vst [vmem:[%s5792_s12 + $0x98] sm:$0xff] %v4065_v22  ;;  %v4067_v23 = vpop.f32.mrb[6].mxu1  ;;  %4271 = vst [vmem:[%s5835_s17 + $0x18] sm:$0xff] (%p4903_p4), %v4270_v34  ;;  %v4284_v46 = vld [vmem:[%s5792_s12 + $0x50] sm:$0xff] (%p4903_p4) }
 0x3ae   : > { %4236 = vst [vmem:[%s5792_s12 + $0xd0] sm:$0xff] %v4067_v23  ;;  %v4069_v44 = vpop.f32.mrb[7].mxu1  ;;  %v4286_v9 = vld [vmem:[%s5792_s12 + $0x58] sm:$0xff] (%p4903_p4)  ;;  %4285 = vst [vmem:[%s5835_s17 + $0x110] sm:$0xff] (%p4903_p4), %v4284_v46 }
 0x3af   : > { %4237 = vst [vmem:[%s5792_s12 + $0xd8] sm:$0xff] %v4069_v44  ;;  %4287 = vst [vmem:[%s5835_s17 + $0x118] sm:$0xff] (%p4903_p4), %v4286_v9  ;;  %v4296_v6 = vld [vmem:[%s5792_s12 + $0x80] sm:$0xff] (%p4903_p4) }
 0x3b0   : > { %v4298_v48 = vld [vmem:[%s5792_s12 + $0x88] sm:$0xff] (%p4903_p4)  ;;  %4297 = vst [vmem:[%s5835_s17 + $0x200] sm:$0xff] (%p4903_p4), %v4296_v6 }
 0x3b1   : > { %4299 = vst [vmem:[%s5835_s17 + $0x208] sm:$0xff] (%p4903_p4), %v4298_v48  ;;  %v4312_v63 = vld [vmem:[%s5792_s12 + $0xc0] sm:$0xff] (%p4903_p4) }
 0x3b2   : > { %v4314_v58 = vld [vmem:[%s5792_s12 + $0xc8] sm:$0xff] (%p4903_p4)  ;;  %4313 = vst [vmem:[%s5835_s17 + $0x300] sm:$0xff] (%p4903_p4), %v4312_v63 }
 0x3b3   : > { %v4106_v24 = vpop.f32.mrb[8].mxu0  ;;  %v4300_v56 = vld [vmem:[%s5792_s12 + $0x90] sm:$0xff] (%p4903_p4)  ;;  %4315 = vst [vmem:[%s5835_s17 + $0x308] sm:$0xff] (%p4903_p4), %v4314_v58 }
 0x3b4   : > { %4214 = vst [vmem:[%s5792_s12 + $0x20] sm:$0xff] %v4106_v24  ;;  %v4108_v54 = vpop.f32.mrb[9].mxu0  ;;  %v4302_v57 = vld [vmem:[%s5792_s12 + $0x98] sm:$0xff] (%p4903_p4)  ;;  %4301 = vst [vmem:[%s5835_s17 + $0x210] sm:$0xff] (%p4903_p4), %v4300_v56 }
 0x3b5   : > { %4215 = vst [vmem:[%s5792_s12 + $0x28] sm:$0xff] %v4108_v54  ;;  %v4110_v33 = vpop.f32.mrb[10].mxu0  ;;  %4303 = vst [vmem:[%s5835_s17 + $0x218] sm:$0xff] (%p4903_p4), %v4302_v57  ;;  %v4316_v59 = vld [vmem:[%s5792_s12 + $0xd0] sm:$0xff] (%p4903_p4) }
 0x3b6   : > { %4222 = vst [vmem:[%s5792_s12 + $0x60] sm:$0xff] %v4110_v33  ;;  %v4112_v55 = vpop.f32.mrb[11].mxu0  ;;  %4317 = vst [vmem:[%s5835_s17 + $0x310] sm:$0xff] (%p4903_p4), %v4316_v59  ;;  %v4318_v30 = vld [vmem:[%s5792_s12 + $0xd8] sm:$0xff] (%p4903_p4) }
 0x3b7   : > { %4223 = vst [vmem:[%s5792_s12 + $0x68] sm:$0xff] %v4112_v55  ;;  %v4159_v25 = vpop.f32.mrb[8].mxu1  ;;  %4319 = vst [vmem:[%s5835_s17 + $0x318] sm:$0xff] (%p4903_p4), %v4318_v30 }
 0x3b8   : > { %4216 = vst [vmem:[%s5792_s12 + $0x30] sm:$0xff] %v4159_v25  ;;  %v4161_v26 = vpop.f32.mrb[9].mxu1 }
 0x3b9   : > { %4217 = vst [vmem:[%s5792_s12 + $0x38] sm:$0xff] %v4161_v26  ;;  %v4163_v27 = vpop.f32.mrb[10].mxu1 }
 0x3ba   : > { %4224 = vst [vmem:[%s5792_s12 + $0x70] sm:$0xff] %v4163_v27  ;;  %v4165_v29 = vpop.f32.mrb[11].mxu1 }
 0x3bb   : > { %4225 = vst [vmem:[%s5792_s12 + $0x78] sm:$0xff] %v4165_v29  ;;  %v4116_v11 = vpop.f32.mrb[12].mxu0  ;;  %v4272_v40 = vld [vmem:[%s5792_s12 + $0x20] sm:$0xff] (%p4903_p4) }
 0x3bc   : > { %4230 = vst [vmem:[%s5792_s12 + $0xa0] sm:$0xff] %v4116_v11  ;;  %v4118_v31 = vpop.f32.mrb[13].mxu0  ;;  %v4274_v35 = vld [vmem:[%s5792_s12 + $0x28] sm:$0xff] (%p4903_p4)  ;;  %4273 = vst [vmem:[%s5835_s17 + $0x20] sm:$0xff] (%p4903_p4), %v4272_v40 }
 0x3bd   : > { %4231 = vst [vmem:[%s5792_s12 + $0xa8] sm:$0xff] %v4118_v31  ;;  %v4120_v28 = vpop.f32.mrb[14].mxu0  ;;  %4248 = sbr.rel (!%p4903_p4) target bundleno = 972 (0x3cc), region = 40  ;;  %4275 = vst [vmem:[%s5835_s17 + $0x28] sm:$0xff] (%p4903_p4), %v4274_v35  ;;  %v4288_v47 = vld [vmem:[%s5792_s12 + $0x60] sm:$0xff] (%p4903_p4) }
 0x3be   : > { %4238 = vst [vmem:[%s5792_s12 + $0xe0] sm:$0xff] %v4120_v28  ;;  %v4122_v36 = vpop.f32.mrb[15].mxu0  ;;  %v4290_v50 = vld [vmem:[%s5792_s12 + $0x68] sm:$0xff] (%p4903_p4)  ;;  %4289 = vst [vmem:[%s5835_s17 + $0x120] sm:$0xff] (%p4903_p4), %v4288_v47 }
 0x3bf   : > { %4239 = vst [vmem:[%s5792_s12 + $0xe8] sm:$0xff] %v4122_v36  ;;  %v4169_v2 = vpop.f32.mrb[12].mxu1  ;;  %v4276_v41 = vld [vmem:[%s5792_s12 + $0x30] sm:$0xff] (%p4903_p4)  ;;  %4291 = vst [vmem:[%s5835_s17 + $0x128] sm:$0xff] (%p4903_p4), %v4290_v50 }
 0x3c0   : > { %4232 = vst [vmem:[%s5792_s12 + $0xb0] sm:$0xff] %v4169_v2  ;;  %v4171_v0 = vpop.f32.mrb[13].mxu1  ;;  %v4278_v39 = vld [vmem:[%s5792_s12 + $0x38] sm:$0xff] (%p4903_p4)  ;;  %4277 = vst [vmem:[%s5835_s17 + $0x30] sm:$0xff] (%p4903_p4), %v4276_v41 }
 0x3c1   : > { %4233 = vst [vmem:[%s5792_s12 + $0xb8] sm:$0xff] %v4171_v0  ;;  %v4173_v37 = vpop.f32.mrb[14].mxu1  ;;  %4279 = vst [vmem:[%s5835_s17 + $0x38] sm:$0xff] (%p4903_p4), %v4278_v39  ;;  %v4292_v51 = vld [vmem:[%s5792_s12 + $0x70] sm:$0xff] (%p4903_p4) }
 0x3c2   : > { %4240 = vst [vmem:[%s5792_s12 + $0xf0] sm:$0xff] %v4173_v37  ;;  %v4175_v38 = vpop.f32.mrb[15].mxu1  ;;  %4293 = vst [vmem:[%s5835_s17 + $0x130] sm:$0xff] (%p4903_p4), %v4292_v51  ;;  %v4294_v53 = vld [vmem:[%s5792_s12 + $0x78] sm:$0xff] (%p4903_p4) }
 0x3c3   : > { %4241 = vst [vmem:[%s5792_s12 + $0xf8] sm:$0xff] %v4175_v38  ;;  %4295 = vst [vmem:[%s5835_s17 + $0x138] sm:$0xff] (%p4903_p4), %v4294_v53  ;;  %v4304_v8 = vld [vmem:[%s5792_s12 + $0xa0] sm:$0xff] (%p4903_p4) }
 0x3c4   : > { %4305 = vst [vmem:[%s5835_s17 + $0x220] sm:$0xff] %v4304_v8  ;;  %v4306_v7 = vld [vmem:[%s5792_s12 + $0xa8] sm:$0xff] }
 0x3c5   : > { %4307 = vst [vmem:[%s5835_s17 + $0x228] sm:$0xff] %v4306_v7  ;;  %v4320_v18 = vld [vmem:[%s5792_s12 + $0xe0] sm:$0xff] }
 0x3c6   : > { %v4322_v19 = vld [vmem:[%s5792_s12 + $0xe8] sm:$0xff]  ;;  %4321 = vst [vmem:[%s5835_s17 + $0x320] sm:$0xff] %v4320_v18 }
 0x3c7   : > { %v4308_v60 = vld [vmem:[%s5792_s12 + $0xb0] sm:$0xff]  ;;  %4323 = vst [vmem:[%s5835_s17 + $0x328] sm:$0xff] %v4322_v19 }
 0x3c8   : > { %v4310_v62 = vld [vmem:[%s5792_s12 + $0xb8] sm:$0xff]  ;;  %4309 = vst [vmem:[%s5835_s17 + $0x230] sm:$0xff] %v4308_v60 }
 0x3c9   : > { %4311 = vst [vmem:[%s5835_s17 + $0x238] sm:$0xff] %v4310_v62  ;;  %v4324_v3 = vld [vmem:[%s5792_s12 + $0xf0] sm:$0xff] }
 0x3ca   : > { %v4326_v5 = vld [vmem:[%s5792_s12 + $0xf8] sm:$0xff]  ;;  %4325 = vst [vmem:[%s5835_s17 + $0x330] sm:$0xff] %v4324_v3 }
 0x3cb   : > { %4327 = vst [vmem:[%s5835_s17 + $0x338] sm:$0xff] %v4326_v5 }
 0x3cc PF: > { %p11_p8 = scmp.ge.s32.totalorder %s4893_s19, 6   ;;  %s5914_s15 = smov %s4830_s16 }
 0x3cd   : > { %s5915_s16 = smov %s4901_s22  ;;  %s5916_s17 = smov %s4893_s19 }
 0x3ce   :  { %13 = sbr.rel (!%p11_p8) target bundleno = 2 (0x2), region = 89 }

</bundles_post_ra>
